<compile_context>
chip_gen: v5e
topology: v5e:2x2
jax: 0.10.0
libtpu: 0.0.40
codegen_flags: <defaults>
</compile_context>

<pallas_src>
import functools

import jax
import jax.numpy as jnp
from jax.experimental import pallas as pl
from jax.experimental.pallas import tpu as pltpu


# ---------------------------------------------------------------------------
# Fused kernel: embed + modal merge (at layer step 0) + encoder layer per step
# ---------------------------------------------------------------------------
def fused_forward_kernel(
    ids_ref,                                   # scalar prefetch: (N*S,) int32 in SMEM
    table_ref,                                 # (vocab, d) f32, left in HBM (pl.ANY)
    img_ref, w_img_ref, b_img_ref,             # (rows, img_dim), (img_dim, d), (1, d)
    aud_ref, w_aud_ref, b_aud_ref,             # (rows, aud_dim), (aud_dim, d), (1, d)
    wm_t_ref, wm_i_ref, wm_a_ref, b_m_ref,     # modal_merge split per modality
    wq_ref, bq_ref, wk_ref, bk_ref, wv_ref, bv_ref, wo_ref, bo_ref,
    ln1w_ref, ln1b_ref, w1_ref, b1_ref, w2_ref, b2_ref, ln2w_ref, ln2b_ref,
    out_ref,                                   # (rows, d)
    x_vmem, text_vmem, attn_vmem, gather_sem,  # scratch
    *, seq_len, batch_block, nhead, compute_dtype):

    f32 = jnp.float32
    eps = 1e-5
    rows = batch_block * seq_len
    d = x_vmem.shape[-1]
    hd = d // nhead
    scale = 1.0 / (hd ** 0.5)

    blk = pl.program_id(0)        # batch block (parallel)
    layer = pl.program_id(1)      # layer index (arbitrary / sequential)

    def mm(a, b):                 # MXU matmul with f32 accumulation
        return jnp.dot(a.astype(compute_dtype), b.astype(compute_dtype),
                       preferred_element_type=f32)

    # ----- first layer step of each batch block: embedding gather + merge ----
    @pl.when(layer == 0)
    def _embed_and_merge():
        base = blk * rows
        # DMA-gather the needed embedding rows straight from the HBM table
        # (ids come from SMEM scalar prefetch).  Start all, then wait all.
        for r in range(rows):
            pltpu.make_async_copy(table_ref.at[pl.ds(ids_ref[base + r], 1)],
                                  text_vmem.at[pl.ds(r, 1)],
                                  gather_sem.at[r]).start()
        for r in range(rows):
            pltpu.make_async_copy(table_ref.at[pl.ds(0, 1)],
                                  text_vmem.at[pl.ds(r, 1)],
                                  gather_sem.at[r]).wait()

        img_emb = mm(img_ref[...], w_img_ref[...]) + b_img_ref[...]
        aud_emb = mm(aud_ref[...], w_aud_ref[...]) + b_aud_ref[...]
        # modal_merge(concat([text, img, aud], -1)) == sum of 3 block matmuls
        x_vmem[...] = (mm(text_vmem[...], wm_t_ref[...])
                       + mm(img_emb, wm_i_ref[...])
                       + mm(aud_emb, wm_a_ref[...])
                       + b_m_ref[...])

    # ----- post-norm TransformerEncoderLayer (relu FFN, dropout = identity) --
    x = x_vmem[...]                               # (rows, d) f32
    q = (mm(x, wq_ref[...]) + bq_ref[...]) * scale
    k = mm(x, wk_ref[...]) + bk_ref[...]
    v = mm(x, wv_ref[...]) + bv_ref[...]

    for b in range(batch_block):                  # static unroll over sequences
        rs = slice(b * seq_len, (b + 1) * seq_len)
        for h in range(nhead):                    # static unroll over heads
            cs = slice(h * hd, (h + 1) * hd)
            qh, kh, vh = q[rs, cs], k[rs, cs], v[rs, cs]
            sc = jnp.einsum('sd,td->st',
                            qh.astype(compute_dtype), kh.astype(compute_dtype),
                            preferred_element_type=f32)
            sc = sc - jnp.max(sc, axis=-1, keepdims=True)
            p = jnp.exp(sc)
            p = p * pl.reciprocal(jnp.sum(p, axis=-1, keepdims=True), approx=True)
            # head outputs go into lane slices of a scratch (no concatenate)
            attn_vmem[rs, cs] = mm(p, vh)

    attn = mm(attn_vmem[...], wo_ref[...]) + bo_ref[...]

    def layer_norm(y, w, bias):
        mu = jnp.mean(y, axis=-1, keepdims=True)
        var = jnp.mean((y - mu) ** 2, axis=-1, keepdims=True)
        return (y - mu) * jax.lax.rsqrt(var + eps) * w + bias

    x1 = layer_norm(x + attn, ln1w_ref[...], ln1b_ref[...])
    h1 = jnp.maximum(mm(x1, w1_ref[...]) + b1_ref[...], 0.0)
    ff_out = mm(h1, w2_ref[...]) + b2_ref[...]
    x_out = layer_norm(x1 + ff_out, ln2w_ref[...], ln2b_ref[...])
    x_vmem[...] = x_out

    @pl.when(layer == pl.num_programs(1) - 1)
    def _store():
        out_ref[...] = x_out.astype(out_ref.dtype)


# ---------------------------------------------------------------------------
# Wrapper: one pallas_call for the whole forward pass
# ---------------------------------------------------------------------------
def multimodal_forward(params, text_inputs, image_inputs, audio_inputs, *,
                       nhead, batch_block=None, compute_dtype=jnp.float32):
    """text (S, N) int, image (S, N, img_dim), audio (S, N, aud_dim) -> (S, N, D)."""
    s, n = text_inputs.shape
    d = params['emb_table'].shape[1]
    img_dim = image_inputs.shape[-1]
    aud_dim = audio_inputs.shape[-1]
    n_layers = params['WQ'].shape[0]
    ff = params['W1'].shape[-1]
    assert d % nhead == 0

    if batch_block is None:
        # Biggest divisor of N that keeps rows-per-step large (fills MXU
        # sublanes / amortizes ~600-cycle grid-step overhead) without blowing
        # VMEM; the remaining batch blocks form the "parallel" grid axis.
        batch_block = n
        for cand in range(min(n, max(1, 512 // s)), 0, -1):
            if n % cand == 0:
                batch_block = cand
                break
    assert n % batch_block == 0
    rows = batch_block * s
    nb = n // batch_block
    assert nb == 1 or rows % 8 == 0, "row block must be sublane-aligned"

    # Batch-first flattening once at the input; single transpose at the output.
    ids = jnp.transpose(text_inputs, (1, 0)).reshape(n * s).astype(jnp.int32)
    img = jnp.transpose(image_inputs, (1, 0, 2)).reshape(n * s, img_dim).astype(jnp.float32)
    aud = jnp.transpose(audio_inputs, (1, 0, 2)).reshape(n * s, aud_dim).astype(jnp.float32)

    def const(shape):            # resident weights (constant block index)
        return pl.BlockSpec(shape, lambda i, l, ids_ref: (0,) * len(shape))

    def rows_blocked(feat):      # row-blocked per batch block
        return pl.BlockSpec((rows, feat), lambda i, l, ids_ref: (i, 0))

    def per_layer(*shape):       # streamed per layer step (leading L dim squeezed)
        return pl.BlockSpec((None,) + shape,
                            lambda i, l, ids_ref: (l,) + (0,) * len(shape))

    in_specs = [
        pl.BlockSpec(memory_space=pl.ANY),               # embedding table in HBM
        rows_blocked(img_dim), const((img_dim, d)), const((1, d)),
        rows_blocked(aud_dim), const((aud_dim, d)), const((1, d)),
        const((d, d)), const((d, d)), const((d, d)), const((1, d)),
        per_layer(d, d), per_layer(1, d),                # q proj
        per_layer(d, d), per_layer(1, d),                # k proj
        per_layer(d, d), per_layer(1, d),                # v proj
        per_layer(d, d), per_layer(1, d),                # out proj
        per_layer(1, d), per_layer(1, d),                # ln1
        per_layer(d, ff), per_layer(1, ff),              # ffn linear1
        per_layer(ff, d), per_layer(1, d),               # ffn linear2
        per_layer(1, d), per_layer(1, d),                # ln2
    ]

    kernel = functools.partial(fused_forward_kernel, seq_len=s,
                               batch_block=batch_block, nhead=nhead,
                               compute_dtype=compute_dtype)

    out2d = pl.pallas_call(
        kernel,
        out_shape=jax.ShapeDtypeStruct((n * s, d), jnp.float32),
        grid_spec=pltpu.PrefetchScalarGridSpec(
            num_scalar_prefetch=1,
            grid=(nb, n_layers),
            in_specs=in_specs,
            out_specs=pl.BlockSpec((rows, d), lambda i, l, ids_ref: (i, 0)),
            scratch_shapes=[
                pltpu.VMEM((rows, d), jnp.float32),      # resident activation
                pltpu.VMEM((rows, d), jnp.float32),      # gathered text embeddings
                pltpu.VMEM((rows, d), jnp.float32),      # attention head outputs
                pltpu.SemaphoreType.DMA((rows,)),        # gather DMA semaphores
            ]),
        compiler_params=pltpu.CompilerParams(
            dimension_semantics=("parallel", "arbitrary"),
            vmem_limit_bytes=32 * 1024 * 1024),
    )(ids, params['emb_table'],
      img, params['w_img'], params['b_img'],
      aud, params['w_aud'], params['b_aud'],
      params['wm_t'], params['wm_i'], params['wm_a'], params['b_m'],
      params['WQ'], params['BQ'], params['WK'], params['BK'],
      params['WV'], params['BV'], params['WO'], params['BO'],
      params['LN1W'], params['LN1B'], params['W1'], params['B1'],
      params['W2'], params['B2'], params['LN2W'], params['LN2B'])

    return out2d.reshape(n, s, d).transpose(1, 0, 2)     # back to (S, N, D)


# ---------------------------------------------------------------------------
# Parameter init (deterministic, synthetic).  Layer weights are stacked along a
# leading L axis so the kernel can stream them per layer step.
# ---------------------------------------------------------------------------
def init_params(key, *, vocab, d, ff, img_dim, aud_dim, n_layers):
    def lin(k, fan_in, fan_out):
        k1, k2 = jax.random.split(k)
        return (jax.random.normal(k1, (fan_in, fan_out), jnp.float32) * 0.05,
                jax.random.normal(k2, (1, fan_out), jnp.float32) * 0.05)

    keys = jax.random.split(key, 4 + n_layers)
    p = {'emb_table': jax.random.normal(keys[0], (vocab, d), jnp.float32) * 0.05}
    p['w_img'], p['b_img'] = lin(keys[1], img_dim, d)
    p['w_aud'], p['b_aud'] = lin(keys[2], aud_dim, d)
    wm, bm = lin(keys[3], 3 * d, d)
    p['wm_t'], p['wm_i'], p['wm_a'] = wm[:d], wm[d:2 * d], wm[2 * d:]
    p['b_m'] = bm

    names = ('WQ', 'BQ', 'WK', 'BK', 'WV', 'BV', 'WO', 'BO',
             'LN1W', 'LN1B', 'W1', 'B1', 'W2', 'B2', 'LN2W', 'LN2B')
    per_layer = {name: [] for name in names}
    for li in range(n_layers):
        lk = jax.random.split(keys[4 + li], 6)
        wq, bq = lin(lk[0], d, d)
        wk, bk = lin(lk[1], d, d)
        wv, bv = lin(lk[2], d, d)
        wo, bo = lin(lk[3], d, d)
        w1, b1 = lin(lk[4], d, ff)
        w2, b2 = lin(lk[5], ff, d)
        vals = dict(WQ=wq, BQ=bq, WK=wk, BK=bk, WV=wv, BV=bv, WO=wo, BO=bo,
                    LN1W=jnp.ones((1, d), jnp.float32),
                    LN1B=jnp.zeros((1, d), jnp.float32),
                    W1=w1, B1=b1, W2=w2, B2=b2,
                    LN2W=jnp.ones((1, d), jnp.float32),
                    LN2B=jnp.zeros((1, d), jnp.float32))
        for name in names:
            per_layer[name].append(vals[name])
    for name in names:
        p[name] = jnp.stack(per_layer[name], axis=0)
    return p


# ---------------------------------------------------------------------------
# Pure-JAX reference (same math, eval-mode dropout identity) for a sanity check
# ---------------------------------------------------------------------------
def reference_forward(params, text_inputs, image_inputs, audio_inputs, *, nhead):
    s, n = text_inputs.shape
    d = params['emb_table'].shape[1]
    eps = 1e-5

    te = params['emb_table'][text_inputs]                          # (S, N, D)
    ie = image_inputs @ params['w_img'] + params['b_img']
    ae = audio_inputs @ params['w_aud'] + params['b_aud']
    x = (te @ params['wm_t'] + ie @ params['wm_i'] + ae @ params['wm_a']
         + params['b_m'])
    x = jnp.transpose(x, (1, 0, 2))                                # (N, S, D)

    def ln(y, w, b):
        mu = y.mean(-1, keepdims=True)
        var = ((y - mu) ** 2).mean(-1, keepdims=True)
        return (y - mu) / jnp.sqrt(var + eps) * w + b

    hd = d // nhead
    for l in range(params['WQ'].shape[0]):
        q = x @ params['WQ'][l] + params['BQ'][l]
        k = x @ params['WK'][l] + params['BK'][l]
        v = x @ params['WV'][l] + params['BV'][l]
        q = q.reshape(n, s, nhead, hd).transpose(0, 2, 1, 3)
        k = k.reshape(n, s, nhead, hd).transpose(0, 2, 1, 3)
        v = v.reshape(n, s, nhead, hd).transpose(0, 2, 1, 3)
        sc = jnp.einsum('nhsd,nhtd->nhst', q, k) / jnp.sqrt(jnp.float32(hd))
        p = jax.nn.softmax(sc, axis=-1)
        a = jnp.einsum('nhst,nhtd->nhsd', p, v)
        a = a.transpose(0, 2, 1, 3).reshape(n, s, d)
        a = a @ params['WO'][l] + params['BO'][l]
        x = ln(x + a, params['LN1W'][l], params['LN1B'][l])
        h = jax.nn.relu(x @ params['W1'][l] + params['B1'][l])
        f = h @ params['W2'][l] + params['B2'][l]
        x = ln(x + f, params['LN2W'][l], params['LN2B'][l])
    return jnp.transpose(x, (1, 0, 2))                             # (S, N, D)


if __name__ == "__main__":
    config = dict(vocab_size=64, embedding_dim=32, initial_attention_heads=2,
                  initial_layers=2, feedforward_dim=64,
                  image_input_dim=48, audio_input_dim=24)
    S, N = 8, 2

    key = jax.random.PRNGKey(0)
    kp, kt, ki, ka = jax.random.split(key, 4)

    params = init_params(kp,
                         vocab=config['vocab_size'], d=config['embedding_dim'],
                         ff=config['feedforward_dim'],
                         img_dim=config['image_input_dim'],
                         aud_dim=config['audio_input_dim'],
                         n_layers=config['initial_layers'])

    text_inputs = jax.random.randint(kt, (S, N), 0, config['vocab_size'],
                                     dtype=jnp.int32)
    image_inputs = jax.random.normal(ki, (S, N, config['image_input_dim']),
                                     jnp.float32)
    audio_inputs = jax.random.normal(ka, (S, N, config['audio_input_dim']),
                                     jnp.float32)

    out = multimodal_forward(params, text_inputs, image_inputs, audio_inputs,
                             nhead=config['initial_attention_heads'])
    jax.block_until_ready(out)
    assert out.shape == (S, N, config['embedding_dim'])

    # Sanity check against the pure-JAX reference (loose tol: softmax uses the
    # EUP approximate reciprocal inside the kernel).
    ref = reference_forward(params, text_inputs, image_inputs, audio_inputs,
                            nhead=config['initial_attention_heads'])
    err = float(jnp.max(jnp.abs(out - ref)))
    assert err < 5e-2, f"kernel vs reference mismatch: max abs err {err}"

    print("KERNEL_OK")
</pallas_src>

<mosaic_0001>
module attributes {stable_mosaic.version = 11 : i64} {
  func.func @fused_forward_kernel(%arg0: i32, %arg1: i32, %arg2: memref<16xi32, #tpu.memory_space<smem>>, %arg3: memref<64x32xf32, #tpu.memory_space<any>>, %arg4: memref<16x48xf32, #tpu.memory_space<vmem>>, %arg5: memref<48x32xf32, #tpu.memory_space<vmem>>, %arg6: memref<1x32xf32, #tpu.memory_space<vmem>>, %arg7: memref<16x24xf32, #tpu.memory_space<vmem>>, %arg8: memref<24x32xf32, #tpu.memory_space<vmem>>, %arg9: memref<1x32xf32, #tpu.memory_space<vmem>>, %arg10: memref<32x32xf32, #tpu.memory_space<vmem>>, %arg11: memref<32x32xf32, #tpu.memory_space<vmem>>, %arg12: memref<32x32xf32, #tpu.memory_space<vmem>>, %arg13: memref<1x32xf32, #tpu.memory_space<vmem>>, %arg14: memref<1x32x32xf32, #tpu.memory_space<vmem>>, %arg15: memref<1x1x32xf32, #tpu.memory_space<vmem>>, %arg16: memref<1x32x32xf32, #tpu.memory_space<vmem>>, %arg17: memref<1x1x32xf32, #tpu.memory_space<vmem>>, %arg18: memref<1x32x32xf32, #tpu.memory_space<vmem>>, %arg19: memref<1x1x32xf32, #tpu.memory_space<vmem>>, %arg20: memref<1x32x32xf32, #tpu.memory_space<vmem>>, %arg21: memref<1x1x32xf32, #tpu.memory_space<vmem>>, %arg22: memref<1x1x32xf32, #tpu.memory_space<vmem>>, %arg23: memref<1x1x32xf32, #tpu.memory_space<vmem>>, %arg24: memref<1x32x64xf32, #tpu.memory_space<vmem>>, %arg25: memref<1x1x64xf32, #tpu.memory_space<vmem>>, %arg26: memref<1x64x32xf32, #tpu.memory_space<vmem>>, %arg27: memref<1x1x32xf32, #tpu.memory_space<vmem>>, %arg28: memref<1x1x32xf32, #tpu.memory_space<vmem>>, %arg29: memref<1x1x32xf32, #tpu.memory_space<vmem>>, %arg30: memref<16x32xf32, #tpu.memory_space<vmem>>, %arg31: memref<16x32xf32, #tpu.memory_space<vmem>>, %arg32: memref<16x32xf32, #tpu.memory_space<vmem>>, %arg33: memref<16x32xf32, #tpu.memory_space<vmem>>, %arg34: memref<16x!tpu.dma_semaphore, #tpu.memory_space<semaphore_mem>>) attributes {dimension_semantics = [#tpu.dimension_semantics<parallel>, #tpu.dimension_semantics<arbitrary>], iteration_bounds = array<i64: 1, 2>, scalar_prefetch = 1 : i64, scratch_operands = 4 : i64, tpu.core_type = #tpu.core_type<tc>, window_params = [{}, {transform_indices = @transform_1, window_bounds = array<i64: 16, 48>}, {pipeline_mode = #tpu.pipeline_mode<synchronous>, transform_indices = @transform_2, window_bounds = array<i64: 48, 32>}, {pipeline_mode = #tpu.pipeline_mode<synchronous>, transform_indices = @transform_3, window_bounds = array<i64: 1, 32>}, {transform_indices = @transform_4, window_bounds = array<i64: 16, 24>}, {pipeline_mode = #tpu.pipeline_mode<synchronous>, transform_indices = @transform_5, window_bounds = array<i64: 24, 32>}, {pipeline_mode = #tpu.pipeline_mode<synchronous>, transform_indices = @transform_6, window_bounds = array<i64: 1, 32>}, {pipeline_mode = #tpu.pipeline_mode<synchronous>, transform_indices = @transform_7, window_bounds = array<i64: 32, 32>}, {pipeline_mode = #tpu.pipeline_mode<synchronous>, transform_indices = @transform_8, window_bounds = array<i64: 32, 32>}, {pipeline_mode = #tpu.pipeline_mode<synchronous>, transform_indices = @transform_9, window_bounds = array<i64: 32, 32>}, {pipeline_mode = #tpu.pipeline_mode<synchronous>, transform_indices = @transform_10, window_bounds = array<i64: 1, 32>}, {transform_indices = @transform_11, window_bounds = array<i64: 1, 32, 32>}, {transform_indices = @transform_12, window_bounds = array<i64: 1, 1, 32>}, {transform_indices = @transform_13, window_bounds = array<i64: 1, 32, 32>}, {transform_indices = @transform_14, window_bounds = array<i64: 1, 1, 32>}, {transform_indices = @transform_15, window_bounds = array<i64: 1, 32, 32>}, {transform_indices = @transform_16, window_bounds = array<i64: 1, 1, 32>}, {transform_indices = @transform_17, window_bounds = array<i64: 1, 32, 32>}, {transform_indices = @transform_18, window_bounds = array<i64: 1, 1, 32>}, {transform_indices = @transform_19, window_bounds = array<i64: 1, 1, 32>}, {transform_indices = @transform_20, window_bounds = array<i64: 1, 1, 32>}, {transform_indices = @transform_21, window_bounds = array<i64: 1, 32, 64>}, {transform_indices = @transform_22, window_bounds = array<i64: 1, 1, 64>}, {transform_indices = @transform_23, window_bounds = array<i64: 1, 64, 32>}, {transform_indices = @transform_24, window_bounds = array<i64: 1, 1, 32>}, {transform_indices = @transform_25, window_bounds = array<i64: 1, 1, 32>}, {transform_indices = @transform_26, window_bounds = array<i64: 1, 1, 32>}, {transform_indices = @transform_27, window_bounds = array<i64: 16, 32>}]} {
    %c0_i32 = arith.constant 0 : i32
    %0 = arith.cmpi eq, %arg1, %c0_i32 : i32
    %1 = arith.extui %0 : i1 to i32
    %c0_i32_0 = arith.constant 0 : i32
    %2 = arith.cmpi ne, %1, %c0_i32_0 : i32
    scf.if %2 {
      %c16_i32 = arith.constant 16 : i32
      %173 = arith.muli %arg0, %c16_i32 : i32
      %c0_i32_94 = arith.constant 0 : i32
      %174 = arith.addi %173, %c0_i32_94 : i32
      %175 = arith.index_cast %174 : i32 to index
      %176 = memref.load %arg2[%175] : memref<16xi32, #tpu.memory_space<smem>>
      %c0_i32_95 = arith.constant 0 : i32
      %c0_i32_96 = arith.constant 0 : i32
      %177 = tpu.memref_slice %arg3[%176, %c0_i32_96] : memref<64x32xf32, #tpu.memory_space<any>> -> memref<1x32xf32, #tpu.memory_space<any>>
      %c0_i32_97 = arith.constant 0 : i32
      %c0_i32_98 = arith.constant 0 : i32
      %178 = tpu.memref_slice %arg32[%c0_i32_97, %c0_i32_98] : memref<16x32xf32, #tpu.memory_space<vmem>> -> memref<1x32xf32, #tpu.memory_space<vmem>>
      %179 = tpu.memref_slice %arg34[%c0_i32_95] : memref<16x!tpu.dma_semaphore, #tpu.memory_space<semaphore_mem>> -> memref<1x!tpu.dma_semaphore, #tpu.memory_space<semaphore_mem>>
      %180 = tpu.memref_squeeze %179 : memref<1x!tpu.dma_semaphore, #tpu.memory_space<semaphore_mem>> -> memref<!tpu.dma_semaphore, #tpu.memory_space<semaphore_mem>>
      tpu.enqueue_dma source(%177 : memref<1x32xf32, #tpu.memory_space<any>>) target(%178 : memref<1x32xf32, #tpu.memory_space<vmem>>) target_semaphore(%180 : memref<!tpu.dma_semaphore, #tpu.memory_space<semaphore_mem>>)
      %c1_i32_99 = arith.constant 1 : i32
      %181 = arith.addi %173, %c1_i32_99 : i32
      %182 = arith.index_cast %181 : i32 to index
      %183 = memref.load %arg2[%182] : memref<16xi32, #tpu.memory_space<smem>>
      %c1_i32_100 = arith.constant 1 : i32
      %c0_i32_101 = arith.constant 0 : i32
      %184 = tpu.memref_slice %arg3[%183, %c0_i32_101] : memref<64x32xf32, #tpu.memory_space<any>> -> memref<1x32xf32, #tpu.memory_space<any>>
      %c1_i32_102 = arith.constant 1 : i32
      %c0_i32_103 = arith.constant 0 : i32
      %185 = tpu.memref_slice %arg32[%c1_i32_102, %c0_i32_103] : memref<16x32xf32, #tpu.memory_space<vmem>> -> memref<1x32xf32, #tpu.memory_space<vmem>>
      %186 = tpu.memref_slice %arg34[%c1_i32_100] : memref<16x!tpu.dma_semaphore, #tpu.memory_space<semaphore_mem>> -> memref<1x!tpu.dma_semaphore, #tpu.memory_space<semaphore_mem>>
      %187 = tpu.memref_squeeze %186 : memref<1x!tpu.dma_semaphore, #tpu.memory_space<semaphore_mem>> -> memref<!tpu.dma_semaphore, #tpu.memory_space<semaphore_mem>>
      tpu.enqueue_dma source(%184 : memref<1x32xf32, #tpu.memory_space<any>>) target(%185 : memref<1x32xf32, #tpu.memory_space<vmem>>) target_semaphore(%187 : memref<!tpu.dma_semaphore, #tpu.memory_space<semaphore_mem>>)
      %c2_i32 = arith.constant 2 : i32
      %188 = arith.addi %173, %c2_i32 : i32
      %189 = arith.index_cast %188 : i32 to index
      %190 = memref.load %arg2[%189] : memref<16xi32, #tpu.memory_space<smem>>
      %c2_i32_104 = arith.constant 2 : i32
      %c0_i32_105 = arith.constant 0 : i32
      %191 = tpu.memref_slice %arg3[%190, %c0_i32_105] : memref<64x32xf32, #tpu.memory_space<any>> -> memref<1x32xf32, #tpu.memory_space<any>>
      %c2_i32_106 = arith.constant 2 : i32
      %c0_i32_107 = arith.constant 0 : i32
      %192 = tpu.memref_slice %arg32[%c2_i32_106, %c0_i32_107] : memref<16x32xf32, #tpu.memory_space<vmem>> -> memref<1x32xf32, #tpu.memory_space<vmem>>
      %193 = tpu.memref_slice %arg34[%c2_i32_104] : memref<16x!tpu.dma_semaphore, #tpu.memory_space<semaphore_mem>> -> memref<1x!tpu.dma_semaphore, #tpu.memory_space<semaphore_mem>>
      %194 = tpu.memref_squeeze %193 : memref<1x!tpu.dma_semaphore, #tpu.memory_space<semaphore_mem>> -> memref<!tpu.dma_semaphore, #tpu.memory_space<semaphore_mem>>
      tpu.enqueue_dma source(%191 : memref<1x32xf32, #tpu.memory_space<any>>) target(%192 : memref<1x32xf32, #tpu.memory_space<vmem>>) target_semaphore(%194 : memref<!tpu.dma_semaphore, #tpu.memory_space<semaphore_mem>>)
      %c3_i32 = arith.constant 3 : i32
      %195 = arith.addi %173, %c3_i32 : i32
      %196 = arith.index_cast %195 : i32 to index
      %197 = memref.load %arg2[%196] : memref<16xi32, #tpu.memory_space<smem>>
      %c3_i32_108 = arith.constant 3 : i32
      %c0_i32_109 = arith.constant 0 : i32
      %198 = tpu.memref_slice %arg3[%197, %c0_i32_109] : memref<64x32xf32, #tpu.memory_space<any>> -> memref<1x32xf32, #tpu.memory_space<any>>
      %c3_i32_110 = arith.constant 3 : i32
      %c0_i32_111 = arith.constant 0 : i32
      %199 = tpu.memref_slice %arg32[%c3_i32_110, %c0_i32_111] : memref<16x32xf32, #tpu.memory_space<vmem>> -> memref<1x32xf32, #tpu.memory_space<vmem>>
      %200 = tpu.memref_slice %arg34[%c3_i32_108] : memref<16x!tpu.dma_semaphore, #tpu.memory_space<semaphore_mem>> -> memref<1x!tpu.dma_semaphore, #tpu.memory_space<semaphore_mem>>
      %201 = tpu.memref_squeeze %200 : memref<1x!tpu.dma_semaphore, #tpu.memory_space<semaphore_mem>> -> memref<!tpu.dma_semaphore, #tpu.memory_space<semaphore_mem>>
      tpu.enqueue_dma source(%198 : memref<1x32xf32, #tpu.memory_space<any>>) target(%199 : memref<1x32xf32, #tpu.memory_space<vmem>>) target_semaphore(%201 : memref<!tpu.dma_semaphore, #tpu.memory_space<semaphore_mem>>)
      %c4_i32 = arith.constant 4 : i32
      %202 = arith.addi %173, %c4_i32 : i32
      %203 = arith.index_cast %202 : i32 to index
      %204 = memref.load %arg2[%203] : memref<16xi32, #tpu.memory_space<smem>>
      %c4_i32_112 = arith.constant 4 : i32
      %c0_i32_113 = arith.constant 0 : i32
      %205 = tpu.memref_slice %arg3[%204, %c0_i32_113] : memref<64x32xf32, #tpu.memory_space<any>> -> memref<1x32xf32, #tpu.memory_space<any>>
      %c4_i32_114 = arith.constant 4 : i32
      %c0_i32_115 = arith.constant 0 : i32
      %206 = tpu.memref_slice %arg32[%c4_i32_114, %c0_i32_115] : memref<16x32xf32, #tpu.memory_space<vmem>> -> memref<1x32xf32, #tpu.memory_space<vmem>>
      %207 = tpu.memref_slice %arg34[%c4_i32_112] : memref<16x!tpu.dma_semaphore, #tpu.memory_space<semaphore_mem>> -> memref<1x!tpu.dma_semaphore, #tpu.memory_space<semaphore_mem>>
      %208 = tpu.memref_squeeze %207 : memref<1x!tpu.dma_semaphore, #tpu.memory_space<semaphore_mem>> -> memref<!tpu.dma_semaphore, #tpu.memory_space<semaphore_mem>>
      tpu.enqueue_dma source(%205 : memref<1x32xf32, #tpu.memory_space<any>>) target(%206 : memref<1x32xf32, #tpu.memory_space<vmem>>) target_semaphore(%208 : memref<!tpu.dma_semaphore, #tpu.memory_space<semaphore_mem>>)
      %c5_i32 = arith.constant 5 : i32
      %209 = arith.addi %173, %c5_i32 : i32
      %210 = arith.index_cast %209 : i32 to index
      %211 = memref.load %arg2[%210] : memref<16xi32, #tpu.memory_space<smem>>
      %c5_i32_116 = arith.constant 5 : i32
      %c0_i32_117 = arith.constant 0 : i32
      %212 = tpu.memref_slice %arg3[%211, %c0_i32_117] : memref<64x32xf32, #tpu.memory_space<any>> -> memref<1x32xf32, #tpu.memory_space<any>>
      %c5_i32_118 = arith.constant 5 : i32
      %c0_i32_119 = arith.constant 0 : i32
      %213 = tpu.memref_slice %arg32[%c5_i32_118, %c0_i32_119] : memref<16x32xf32, #tpu.memory_space<vmem>> -> memref<1x32xf32, #tpu.memory_space<vmem>>
      %214 = tpu.memref_slice %arg34[%c5_i32_116] : memref<16x!tpu.dma_semaphore, #tpu.memory_space<semaphore_mem>> -> memref<1x!tpu.dma_semaphore, #tpu.memory_space<semaphore_mem>>
      %215 = tpu.memref_squeeze %214 : memref<1x!tpu.dma_semaphore, #tpu.memory_space<semaphore_mem>> -> memref<!tpu.dma_semaphore, #tpu.memory_space<semaphore_mem>>
      tpu.enqueue_dma source(%212 : memref<1x32xf32, #tpu.memory_space<any>>) target(%213 : memref<1x32xf32, #tpu.memory_space<vmem>>) target_semaphore(%215 : memref<!tpu.dma_semaphore, #tpu.memory_space<semaphore_mem>>)
      %c6_i32 = arith.constant 6 : i32
      %216 = arith.addi %173, %c6_i32 : i32
      %217 = arith.index_cast %216 : i32 to index
      %218 = memref.load %arg2[%217] : memref<16xi32, #tpu.memory_space<smem>>
      %c6_i32_120 = arith.constant 6 : i32
      %c0_i32_121 = arith.constant 0 : i32
      %219 = tpu.memref_slice %arg3[%218, %c0_i32_121] : memref<64x32xf32, #tpu.memory_space<any>> -> memref<1x32xf32, #tpu.memory_space<any>>
      %c6_i32_122 = arith.constant 6 : i32
      %c0_i32_123 = arith.constant 0 : i32
      %220 = tpu.memref_slice %arg32[%c6_i32_122, %c0_i32_123] : memref<16x32xf32, #tpu.memory_space<vmem>> -> memref<1x32xf32, #tpu.memory_space<vmem>>
      %221 = tpu.memref_slice %arg34[%c6_i32_120] : memref<16x!tpu.dma_semaphore, #tpu.memory_space<semaphore_mem>> -> memref<1x!tpu.dma_semaphore, #tpu.memory_space<semaphore_mem>>
      %222 = tpu.memref_squeeze %221 : memref<1x!tpu.dma_semaphore, #tpu.memory_space<semaphore_mem>> -> memref<!tpu.dma_semaphore, #tpu.memory_space<semaphore_mem>>
      tpu.enqueue_dma source(%219 : memref<1x32xf32, #tpu.memory_space<any>>) target(%220 : memref<1x32xf32, #tpu.memory_space<vmem>>) target_semaphore(%222 : memref<!tpu.dma_semaphore, #tpu.memory_space<semaphore_mem>>)
      %c7_i32 = arith.constant 7 : i32
      %223 = arith.addi %173, %c7_i32 : i32
      %224 = arith.index_cast %223 : i32 to index
      %225 = memref.load %arg2[%224] : memref<16xi32, #tpu.memory_space<smem>>
      %c7_i32_124 = arith.constant 7 : i32
      %c0_i32_125 = arith.constant 0 : i32
      %226 = tpu.memref_slice %arg3[%225, %c0_i32_125] : memref<64x32xf32, #tpu.memory_space<any>> -> memref<1x32xf32, #tpu.memory_space<any>>
      %c7_i32_126 = arith.constant 7 : i32
      %c0_i32_127 = arith.constant 0 : i32
      %227 = tpu.memref_slice %arg32[%c7_i32_126, %c0_i32_127] : memref<16x32xf32, #tpu.memory_space<vmem>> -> memref<1x32xf32, #tpu.memory_space<vmem>>
      %228 = tpu.memref_slice %arg34[%c7_i32_124] : memref<16x!tpu.dma_semaphore, #tpu.memory_space<semaphore_mem>> -> memref<1x!tpu.dma_semaphore, #tpu.memory_space<semaphore_mem>>
      %229 = tpu.memref_squeeze %228 : memref<1x!tpu.dma_semaphore, #tpu.memory_space<semaphore_mem>> -> memref<!tpu.dma_semaphore, #tpu.memory_space<semaphore_mem>>
      tpu.enqueue_dma source(%226 : memref<1x32xf32, #tpu.memory_space<any>>) target(%227 : memref<1x32xf32, #tpu.memory_space<vmem>>) target_semaphore(%229 : memref<!tpu.dma_semaphore, #tpu.memory_space<semaphore_mem>>)
      %c8_i32 = arith.constant 8 : i32
      %230 = arith.addi %173, %c8_i32 : i32
      %231 = arith.index_cast %230 : i32 to index
      %232 = memref.load %arg2[%231] : memref<16xi32, #tpu.memory_space<smem>>
      %c8_i32_128 = arith.constant 8 : i32
      %c0_i32_129 = arith.constant 0 : i32
      %233 = tpu.memref_slice %arg3[%232, %c0_i32_129] : memref<64x32xf32, #tpu.memory_space<any>> -> memref<1x32xf32, #tpu.memory_space<any>>
      %c8_i32_130 = arith.constant 8 : i32
      %c0_i32_131 = arith.constant 0 : i32
      %234 = tpu.memref_slice %arg32[%c8_i32_130, %c0_i32_131] : memref<16x32xf32, #tpu.memory_space<vmem>> -> memref<1x32xf32, #tpu.memory_space<vmem>>
      %235 = tpu.memref_slice %arg34[%c8_i32_128] : memref<16x!tpu.dma_semaphore, #tpu.memory_space<semaphore_mem>> -> memref<1x!tpu.dma_semaphore, #tpu.memory_space<semaphore_mem>>
      %236 = tpu.memref_squeeze %235 : memref<1x!tpu.dma_semaphore, #tpu.memory_space<semaphore_mem>> -> memref<!tpu.dma_semaphore, #tpu.memory_space<semaphore_mem>>
      tpu.enqueue_dma source(%233 : memref<1x32xf32, #tpu.memory_space<any>>) target(%234 : memref<1x32xf32, #tpu.memory_space<vmem>>) target_semaphore(%236 : memref<!tpu.dma_semaphore, #tpu.memory_space<semaphore_mem>>)
      %c9_i32 = arith.constant 9 : i32
      %237 = arith.addi %173, %c9_i32 : i32
      %238 = arith.index_cast %237 : i32 to index
      %239 = memref.load %arg2[%238] : memref<16xi32, #tpu.memory_space<smem>>
      %c9_i32_132 = arith.constant 9 : i32
      %c0_i32_133 = arith.constant 0 : i32
      %240 = tpu.memref_slice %arg3[%239, %c0_i32_133] : memref<64x32xf32, #tpu.memory_space<any>> -> memref<1x32xf32, #tpu.memory_space<any>>
      %c9_i32_134 = arith.constant 9 : i32
      %c0_i32_135 = arith.constant 0 : i32
      %241 = tpu.memref_slice %arg32[%c9_i32_134, %c0_i32_135] : memref<16x32xf32, #tpu.memory_space<vmem>> -> memref<1x32xf32, #tpu.memory_space<vmem>>
      %242 = tpu.memref_slice %arg34[%c9_i32_132] : memref<16x!tpu.dma_semaphore, #tpu.memory_space<semaphore_mem>> -> memref<1x!tpu.dma_semaphore, #tpu.memory_space<semaphore_mem>>
      %243 = tpu.memref_squeeze %242 : memref<1x!tpu.dma_semaphore, #tpu.memory_space<semaphore_mem>> -> memref<!tpu.dma_semaphore, #tpu.memory_space<semaphore_mem>>
      tpu.enqueue_dma source(%240 : memref<1x32xf32, #tpu.memory_space<any>>) target(%241 : memref<1x32xf32, #tpu.memory_space<vmem>>) target_semaphore(%243 : memref<!tpu.dma_semaphore, #tpu.memory_space<semaphore_mem>>)
      %c10_i32 = arith.constant 10 : i32
      %244 = arith.addi %173, %c10_i32 : i32
      %245 = arith.index_cast %244 : i32 to index
      %246 = memref.load %arg2[%245] : memref<16xi32, #tpu.memory_space<smem>>
      %c10_i32_136 = arith.constant 10 : i32
      %c0_i32_137 = arith.constant 0 : i32
      %247 = tpu.memref_slice %arg3[%246, %c0_i32_137] : memref<64x32xf32, #tpu.memory_space<any>> -> memref<1x32xf32, #tpu.memory_space<any>>
      %c10_i32_138 = arith.constant 10 : i32
      %c0_i32_139 = arith.constant 0 : i32
      %248 = tpu.memref_slice %arg32[%c10_i32_138, %c0_i32_139] : memref<16x32xf32, #tpu.memory_space<vmem>> -> memref<1x32xf32, #tpu.memory_space<vmem>>
      %249 = tpu.memref_slice %arg34[%c10_i32_136] : memref<16x!tpu.dma_semaphore, #tpu.memory_space<semaphore_mem>> -> memref<1x!tpu.dma_semaphore, #tpu.memory_space<semaphore_mem>>
      %250 = tpu.memref_squeeze %249 : memref<1x!tpu.dma_semaphore, #tpu.memory_space<semaphore_mem>> -> memref<!tpu.dma_semaphore, #tpu.memory_space<semaphore_mem>>
      tpu.enqueue_dma source(%247 : memref<1x32xf32, #tpu.memory_space<any>>) target(%248 : memref<1x32xf32, #tpu.memory_space<vmem>>) target_semaphore(%250 : memref<!tpu.dma_semaphore, #tpu.memory_space<semaphore_mem>>)
      %c11_i32 = arith.constant 11 : i32
      %251 = arith.addi %173, %c11_i32 : i32
      %252 = arith.index_cast %251 : i32 to index
      %253 = memref.load %arg2[%252] : memref<16xi32, #tpu.memory_space<smem>>
      %c11_i32_140 = arith.constant 11 : i32
      %c0_i32_141 = arith.constant 0 : i32
      %254 = tpu.memref_slice %arg3[%253, %c0_i32_141] : memref<64x32xf32, #tpu.memory_space<any>> -> memref<1x32xf32, #tpu.memory_space<any>>
      %c11_i32_142 = arith.constant 11 : i32
      %c0_i32_143 = arith.constant 0 : i32
      %255 = tpu.memref_slice %arg32[%c11_i32_142, %c0_i32_143] : memref<16x32xf32, #tpu.memory_space<vmem>> -> memref<1x32xf32, #tpu.memory_space<vmem>>
      %256 = tpu.memref_slice %arg34[%c11_i32_140] : memref<16x!tpu.dma_semaphore, #tpu.memory_space<semaphore_mem>> -> memref<1x!tpu.dma_semaphore, #tpu.memory_space<semaphore_mem>>
      %257 = tpu.memref_squeeze %256 : memref<1x!tpu.dma_semaphore, #tpu.memory_space<semaphore_mem>> -> memref<!tpu.dma_semaphore, #tpu.memory_space<semaphore_mem>>
      tpu.enqueue_dma source(%254 : memref<1x32xf32, #tpu.memory_space<any>>) target(%255 : memref<1x32xf32, #tpu.memory_space<vmem>>) target_semaphore(%257 : memref<!tpu.dma_semaphore, #tpu.memory_space<semaphore_mem>>)
      %c12_i32 = arith.constant 12 : i32
      %258 = arith.addi %173, %c12_i32 : i32
      %259 = arith.index_cast %258 : i32 to index
      %260 = memref.load %arg2[%259] : memref<16xi32, #tpu.memory_space<smem>>
      %c12_i32_144 = arith.constant 12 : i32
      %c0_i32_145 = arith.constant 0 : i32
      %261 = tpu.memref_slice %arg3[%260, %c0_i32_145] : memref<64x32xf32, #tpu.memory_space<any>> -> memref<1x32xf32, #tpu.memory_space<any>>
      %c12_i32_146 = arith.constant 12 : i32
      %c0_i32_147 = arith.constant 0 : i32
      %262 = tpu.memref_slice %arg32[%c12_i32_146, %c0_i32_147] : memref<16x32xf32, #tpu.memory_space<vmem>> -> memref<1x32xf32, #tpu.memory_space<vmem>>
      %263 = tpu.memref_slice %arg34[%c12_i32_144] : memref<16x!tpu.dma_semaphore, #tpu.memory_space<semaphore_mem>> -> memref<1x!tpu.dma_semaphore, #tpu.memory_space<semaphore_mem>>
      %264 = tpu.memref_squeeze %263 : memref<1x!tpu.dma_semaphore, #tpu.memory_space<semaphore_mem>> -> memref<!tpu.dma_semaphore, #tpu.memory_space<semaphore_mem>>
      tpu.enqueue_dma source(%261 : memref<1x32xf32, #tpu.memory_space<any>>) target(%262 : memref<1x32xf32, #tpu.memory_space<vmem>>) target_semaphore(%264 : memref<!tpu.dma_semaphore, #tpu.memory_space<semaphore_mem>>)
      %c13_i32 = arith.constant 13 : i32
      %265 = arith.addi %173, %c13_i32 : i32
      %266 = arith.index_cast %265 : i32 to index
      %267 = memref.load %arg2[%266] : memref<16xi32, #tpu.memory_space<smem>>
      %c13_i32_148 = arith.constant 13 : i32
      %c0_i32_149 = arith.constant 0 : i32
      %268 = tpu.memref_slice %arg3[%267, %c0_i32_149] : memref<64x32xf32, #tpu.memory_space<any>> -> memref<1x32xf32, #tpu.memory_space<any>>
      %c13_i32_150 = arith.constant 13 : i32
      %c0_i32_151 = arith.constant 0 : i32
      %269 = tpu.memref_slice %arg32[%c13_i32_150, %c0_i32_151] : memref<16x32xf32, #tpu.memory_space<vmem>> -> memref<1x32xf32, #tpu.memory_space<vmem>>
      %270 = tpu.memref_slice %arg34[%c13_i32_148] : memref<16x!tpu.dma_semaphore, #tpu.memory_space<semaphore_mem>> -> memref<1x!tpu.dma_semaphore, #tpu.memory_space<semaphore_mem>>
      %271 = tpu.memref_squeeze %270 : memref<1x!tpu.dma_semaphore, #tpu.memory_space<semaphore_mem>> -> memref<!tpu.dma_semaphore, #tpu.memory_space<semaphore_mem>>
      tpu.enqueue_dma source(%268 : memref<1x32xf32, #tpu.memory_space<any>>) target(%269 : memref<1x32xf32, #tpu.memory_space<vmem>>) target_semaphore(%271 : memref<!tpu.dma_semaphore, #tpu.memory_space<semaphore_mem>>)
      %c14_i32 = arith.constant 14 : i32
      %272 = arith.addi %173, %c14_i32 : i32
      %273 = arith.index_cast %272 : i32 to index
      %274 = memref.load %arg2[%273] : memref<16xi32, #tpu.memory_space<smem>>
      %c14_i32_152 = arith.constant 14 : i32
      %c0_i32_153 = arith.constant 0 : i32
      %275 = tpu.memref_slice %arg3[%274, %c0_i32_153] : memref<64x32xf32, #tpu.memory_space<any>> -> memref<1x32xf32, #tpu.memory_space<any>>
      %c14_i32_154 = arith.constant 14 : i32
      %c0_i32_155 = arith.constant 0 : i32
      %276 = tpu.memref_slice %arg32[%c14_i32_154, %c0_i32_155] : memref<16x32xf32, #tpu.memory_space<vmem>> -> memref<1x32xf32, #tpu.memory_space<vmem>>
      %277 = tpu.memref_slice %arg34[%c14_i32_152] : memref<16x!tpu.dma_semaphore, #tpu.memory_space<semaphore_mem>> -> memref<1x!tpu.dma_semaphore, #tpu.memory_space<semaphore_mem>>
      %278 = tpu.memref_squeeze %277 : memref<1x!tpu.dma_semaphore, #tpu.memory_space<semaphore_mem>> -> memref<!tpu.dma_semaphore, #tpu.memory_space<semaphore_mem>>
      tpu.enqueue_dma source(%275 : memref<1x32xf32, #tpu.memory_space<any>>) target(%276 : memref<1x32xf32, #tpu.memory_space<vmem>>) target_semaphore(%278 : memref<!tpu.dma_semaphore, #tpu.memory_space<semaphore_mem>>)
      %c15_i32 = arith.constant 15 : i32
      %279 = arith.addi %173, %c15_i32 : i32
      %280 = arith.index_cast %279 : i32 to index
      %281 = memref.load %arg2[%280] : memref<16xi32, #tpu.memory_space<smem>>
      %c15_i32_156 = arith.constant 15 : i32
      %c0_i32_157 = arith.constant 0 : i32
      %282 = tpu.memref_slice %arg3[%281, %c0_i32_157] : memref<64x32xf32, #tpu.memory_space<any>> -> memref<1x32xf32, #tpu.memory_space<any>>
      %c15_i32_158 = arith.constant 15 : i32
      %c0_i32_159 = arith.constant 0 : i32
      %283 = tpu.memref_slice %arg32[%c15_i32_158, %c0_i32_159] : memref<16x32xf32, #tpu.memory_space<vmem>> -> memref<1x32xf32, #tpu.memory_space<vmem>>
      %284 = tpu.memref_slice %arg34[%c15_i32_156] : memref<16x!tpu.dma_semaphore, #tpu.memory_space<semaphore_mem>> -> memref<1x!tpu.dma_semaphore, #tpu.memory_space<semaphore_mem>>
      %285 = tpu.memref_squeeze %284 : memref<1x!tpu.dma_semaphore, #tpu.memory_space<semaphore_mem>> -> memref<!tpu.dma_semaphore, #tpu.memory_space<semaphore_mem>>
      tpu.enqueue_dma source(%282 : memref<1x32xf32, #tpu.memory_space<any>>) target(%283 : memref<1x32xf32, #tpu.memory_space<vmem>>) target_semaphore(%285 : memref<!tpu.dma_semaphore, #tpu.memory_space<semaphore_mem>>)
      %c0_i32_160 = arith.constant 0 : i32
      %c0_i32_161 = arith.constant 0 : i32
      %c0_i32_162 = arith.constant 0 : i32
      %286 = tpu.memref_slice %arg3[%c0_i32_161, %c0_i32_162] : memref<64x32xf32, #tpu.memory_space<any>> -> memref<1x32xf32, #tpu.memory_space<any>>
      %c0_i32_163 = arith.constant 0 : i32
      %c0_i32_164 = arith.constant 0 : i32
      %287 = tpu.memref_slice %arg32[%c0_i32_163, %c0_i32_164] : memref<16x32xf32, #tpu.memory_space<vmem>> -> memref<1x32xf32, #tpu.memory_space<vmem>>
      %288 = tpu.memref_slice %arg34[%c0_i32_160] : memref<16x!tpu.dma_semaphore, #tpu.memory_space<semaphore_mem>> -> memref<1x!tpu.dma_semaphore, #tpu.memory_space<semaphore_mem>>
      %289 = tpu.memref_squeeze %288 : memref<1x!tpu.dma_semaphore, #tpu.memory_space<semaphore_mem>> -> memref<!tpu.dma_semaphore, #tpu.memory_space<semaphore_mem>>
      tpu.wait_dma2 semaphore(%289 : memref<!tpu.dma_semaphore, #tpu.memory_space<semaphore_mem>>) src(%286 : memref<1x32xf32, #tpu.memory_space<any>>) dst(%287 : memref<1x32xf32, #tpu.memory_space<vmem>>)
      %c1_i32_165 = arith.constant 1 : i32
      %c0_i32_166 = arith.constant 0 : i32
      %c0_i32_167 = arith.constant 0 : i32
      %290 = tpu.memref_slice %arg3[%c0_i32_166, %c0_i32_167] : memref<64x32xf32, #tpu.memory_space<any>> -> memref<1x32xf32, #tpu.memory_space<any>>
      %c1_i32_168 = arith.constant 1 : i32
      %c0_i32_169 = arith.constant 0 : i32
      %291 = tpu.memref_slice %arg32[%c1_i32_168, %c0_i32_169] : memref<16x32xf32, #tpu.memory_space<vmem>> -> memref<1x32xf32, #tpu.memory_space<vmem>>
      %292 = tpu.memref_slice %arg34[%c1_i32_165] : memref<16x!tpu.dma_semaphore, #tpu.memory_space<semaphore_mem>> -> memref<1x!tpu.dma_semaphore, #tpu.memory_space<semaphore_mem>>
      %293 = tpu.memref_squeeze %292 : memref<1x!tpu.dma_semaphore, #tpu.memory_space<semaphore_mem>> -> memref<!tpu.dma_semaphore, #tpu.memory_space<semaphore_mem>>
      tpu.wait_dma2 semaphore(%293 : memref<!tpu.dma_semaphore, #tpu.memory_space<semaphore_mem>>) src(%290 : memref<1x32xf32, #tpu.memory_space<any>>) dst(%291 : memref<1x32xf32, #tpu.memory_space<vmem>>)
      %c2_i32_170 = arith.constant 2 : i32
      %c0_i32_171 = arith.constant 0 : i32
      %c0_i32_172 = arith.constant 0 : i32
      %294 = tpu.memref_slice %arg3[%c0_i32_171, %c0_i32_172] : memref<64x32xf32, #tpu.memory_space<any>> -> memref<1x32xf32, #tpu.memory_space<any>>
      %c2_i32_173 = arith.constant 2 : i32
      %c0_i32_174 = arith.constant 0 : i32
      %295 = tpu.memref_slice %arg32[%c2_i32_173, %c0_i32_174] : memref<16x32xf32, #tpu.memory_space<vmem>> -> memref<1x32xf32, #tpu.memory_space<vmem>>
      %296 = tpu.memref_slice %arg34[%c2_i32_170] : memref<16x!tpu.dma_semaphore, #tpu.memory_space<semaphore_mem>> -> memref<1x!tpu.dma_semaphore, #tpu.memory_space<semaphore_mem>>
      %297 = tpu.memref_squeeze %296 : memref<1x!tpu.dma_semaphore, #tpu.memory_space<semaphore_mem>> -> memref<!tpu.dma_semaphore, #tpu.memory_space<semaphore_mem>>
      tpu.wait_dma2 semaphore(%297 : memref<!tpu.dma_semaphore, #tpu.memory_space<semaphore_mem>>) src(%294 : memref<1x32xf32, #tpu.memory_space<any>>) dst(%295 : memref<1x32xf32, #tpu.memory_space<vmem>>)
      %c3_i32_175 = arith.constant 3 : i32
      %c0_i32_176 = arith.constant 0 : i32
      %c0_i32_177 = arith.constant 0 : i32
      %298 = tpu.memref_slice %arg3[%c0_i32_176, %c0_i32_177] : memref<64x32xf32, #tpu.memory_space<any>> -> memref<1x32xf32, #tpu.memory_space<any>>
      %c3_i32_178 = arith.constant 3 : i32
      %c0_i32_179 = arith.constant 0 : i32
      %299 = tpu.memref_slice %arg32[%c3_i32_178, %c0_i32_179] : memref<16x32xf32, #tpu.memory_space<vmem>> -> memref<1x32xf32, #tpu.memory_space<vmem>>
      %300 = tpu.memref_slice %arg34[%c3_i32_175] : memref<16x!tpu.dma_semaphore, #tpu.memory_space<semaphore_mem>> -> memref<1x!tpu.dma_semaphore, #tpu.memory_space<semaphore_mem>>
      %301 = tpu.memref_squeeze %300 : memref<1x!tpu.dma_semaphore, #tpu.memory_space<semaphore_mem>> -> memref<!tpu.dma_semaphore, #tpu.memory_space<semaphore_mem>>
      tpu.wait_dma2 semaphore(%301 : memref<!tpu.dma_semaphore, #tpu.memory_space<semaphore_mem>>) src(%298 : memref<1x32xf32, #tpu.memory_space<any>>) dst(%299 : memref<1x32xf32, #tpu.memory_space<vmem>>)
      %c4_i32_180 = arith.constant 4 : i32
      %c0_i32_181 = arith.constant 0 : i32
      %c0_i32_182 = arith.constant 0 : i32
      %302 = tpu.memref_slice %arg3[%c0_i32_181, %c0_i32_182] : memref<64x32xf32, #tpu.memory_space<any>> -> memref<1x32xf32, #tpu.memory_space<any>>
      %c4_i32_183 = arith.constant 4 : i32
      %c0_i32_184 = arith.constant 0 : i32
      %303 = tpu.memref_slice %arg32[%c4_i32_183, %c0_i32_184] : memref<16x32xf32, #tpu.memory_space<vmem>> -> memref<1x32xf32, #tpu.memory_space<vmem>>
      %304 = tpu.memref_slice %arg34[%c4_i32_180] : memref<16x!tpu.dma_semaphore, #tpu.memory_space<semaphore_mem>> -> memref<1x!tpu.dma_semaphore, #tpu.memory_space<semaphore_mem>>
      %305 = tpu.memref_squeeze %304 : memref<1x!tpu.dma_semaphore, #tpu.memory_space<semaphore_mem>> -> memref<!tpu.dma_semaphore, #tpu.memory_space<semaphore_mem>>
      tpu.wait_dma2 semaphore(%305 : memref<!tpu.dma_semaphore, #tpu.memory_space<semaphore_mem>>) src(%302 : memref<1x32xf32, #tpu.memory_space<any>>) dst(%303 : memref<1x32xf32, #tpu.memory_space<vmem>>)
      %c5_i32_185 = arith.constant 5 : i32
      %c0_i32_186 = arith.constant 0 : i32
      %c0_i32_187 = arith.constant 0 : i32
      %306 = tpu.memref_slice %arg3[%c0_i32_186, %c0_i32_187] : memref<64x32xf32, #tpu.memory_space<any>> -> memref<1x32xf32, #tpu.memory_space<any>>
      %c5_i32_188 = arith.constant 5 : i32
      %c0_i32_189 = arith.constant 0 : i32
      %307 = tpu.memref_slice %arg32[%c5_i32_188, %c0_i32_189] : memref<16x32xf32, #tpu.memory_space<vmem>> -> memref<1x32xf32, #tpu.memory_space<vmem>>
      %308 = tpu.memref_slice %arg34[%c5_i32_185] : memref<16x!tpu.dma_semaphore, #tpu.memory_space<semaphore_mem>> -> memref<1x!tpu.dma_semaphore, #tpu.memory_space<semaphore_mem>>
      %309 = tpu.memref_squeeze %308 : memref<1x!tpu.dma_semaphore, #tpu.memory_space<semaphore_mem>> -> memref<!tpu.dma_semaphore, #tpu.memory_space<semaphore_mem>>
      tpu.wait_dma2 semaphore(%309 : memref<!tpu.dma_semaphore, #tpu.memory_space<semaphore_mem>>) src(%306 : memref<1x32xf32, #tpu.memory_space<any>>) dst(%307 : memref<1x32xf32, #tpu.memory_space<vmem>>)
      %c6_i32_190 = arith.constant 6 : i32
      %c0_i32_191 = arith.constant 0 : i32
      %c0_i32_192 = arith.constant 0 : i32
      %310 = tpu.memref_slice %arg3[%c0_i32_191, %c0_i32_192] : memref<64x32xf32, #tpu.memory_space<any>> -> memref<1x32xf32, #tpu.memory_space<any>>
      %c6_i32_193 = arith.constant 6 : i32
      %c0_i32_194 = arith.constant 0 : i32
      %311 = tpu.memref_slice %arg32[%c6_i32_193, %c0_i32_194] : memref<16x32xf32, #tpu.memory_space<vmem>> -> memref<1x32xf32, #tpu.memory_space<vmem>>
      %312 = tpu.memref_slice %arg34[%c6_i32_190] : memref<16x!tpu.dma_semaphore, #tpu.memory_space<semaphore_mem>> -> memref<1x!tpu.dma_semaphore, #tpu.memory_space<semaphore_mem>>
      %313 = tpu.memref_squeeze %312 : memref<1x!tpu.dma_semaphore, #tpu.memory_space<semaphore_mem>> -> memref<!tpu.dma_semaphore, #tpu.memory_space<semaphore_mem>>
      tpu.wait_dma2 semaphore(%313 : memref<!tpu.dma_semaphore, #tpu.memory_space<semaphore_mem>>) src(%310 : memref<1x32xf32, #tpu.memory_space<any>>) dst(%311 : memref<1x32xf32, #tpu.memory_space<vmem>>)
      %c7_i32_195 = arith.constant 7 : i32
      %c0_i32_196 = arith.constant 0 : i32
      %c0_i32_197 = arith.constant 0 : i32
      %314 = tpu.memref_slice %arg3[%c0_i32_196, %c0_i32_197] : memref<64x32xf32, #tpu.memory_space<any>> -> memref<1x32xf32, #tpu.memory_space<any>>
      %c7_i32_198 = arith.constant 7 : i32
      %c0_i32_199 = arith.constant 0 : i32
      %315 = tpu.memref_slice %arg32[%c7_i32_198, %c0_i32_199] : memref<16x32xf32, #tpu.memory_space<vmem>> -> memref<1x32xf32, #tpu.memory_space<vmem>>
      %316 = tpu.memref_slice %arg34[%c7_i32_195] : memref<16x!tpu.dma_semaphore, #tpu.memory_space<semaphore_mem>> -> memref<1x!tpu.dma_semaphore, #tpu.memory_space<semaphore_mem>>
      %317 = tpu.memref_squeeze %316 : memref<1x!tpu.dma_semaphore, #tpu.memory_space<semaphore_mem>> -> memref<!tpu.dma_semaphore, #tpu.memory_space<semaphore_mem>>
      tpu.wait_dma2 semaphore(%317 : memref<!tpu.dma_semaphore, #tpu.memory_space<semaphore_mem>>) src(%314 : memref<1x32xf32, #tpu.memory_space<any>>) dst(%315 : memref<1x32xf32, #tpu.memory_space<vmem>>)
      %c8_i32_200 = arith.constant 8 : i32
      %c0_i32_201 = arith.constant 0 : i32
      %c0_i32_202 = arith.constant 0 : i32
      %318 = tpu.memref_slice %arg3[%c0_i32_201, %c0_i32_202] : memref<64x32xf32, #tpu.memory_space<any>> -> memref<1x32xf32, #tpu.memory_space<any>>
      %c8_i32_203 = arith.constant 8 : i32
      %c0_i32_204 = arith.constant 0 : i32
      %319 = tpu.memref_slice %arg32[%c8_i32_203, %c0_i32_204] : memref<16x32xf32, #tpu.memory_space<vmem>> -> memref<1x32xf32, #tpu.memory_space<vmem>>
      %320 = tpu.memref_slice %arg34[%c8_i32_200] : memref<16x!tpu.dma_semaphore, #tpu.memory_space<semaphore_mem>> -> memref<1x!tpu.dma_semaphore, #tpu.memory_space<semaphore_mem>>
      %321 = tpu.memref_squeeze %320 : memref<1x!tpu.dma_semaphore, #tpu.memory_space<semaphore_mem>> -> memref<!tpu.dma_semaphore, #tpu.memory_space<semaphore_mem>>
      tpu.wait_dma2 semaphore(%321 : memref<!tpu.dma_semaphore, #tpu.memory_space<semaphore_mem>>) src(%318 : memref<1x32xf32, #tpu.memory_space<any>>) dst(%319 : memref<1x32xf32, #tpu.memory_space<vmem>>)
      %c9_i32_205 = arith.constant 9 : i32
      %c0_i32_206 = arith.constant 0 : i32
      %c0_i32_207 = arith.constant 0 : i32
      %322 = tpu.memref_slice %arg3[%c0_i32_206, %c0_i32_207] : memref<64x32xf32, #tpu.memory_space<any>> -> memref<1x32xf32, #tpu.memory_space<any>>
      %c9_i32_208 = arith.constant 9 : i32
      %c0_i32_209 = arith.constant 0 : i32
      %323 = tpu.memref_slice %arg32[%c9_i32_208, %c0_i32_209] : memref<16x32xf32, #tpu.memory_space<vmem>> -> memref<1x32xf32, #tpu.memory_space<vmem>>
      %324 = tpu.memref_slice %arg34[%c9_i32_205] : memref<16x!tpu.dma_semaphore, #tpu.memory_space<semaphore_mem>> -> memref<1x!tpu.dma_semaphore, #tpu.memory_space<semaphore_mem>>
      %325 = tpu.memref_squeeze %324 : memref<1x!tpu.dma_semaphore, #tpu.memory_space<semaphore_mem>> -> memref<!tpu.dma_semaphore, #tpu.memory_space<semaphore_mem>>
      tpu.wait_dma2 semaphore(%325 : memref<!tpu.dma_semaphore, #tpu.memory_space<semaphore_mem>>) src(%322 : memref<1x32xf32, #tpu.memory_space<any>>) dst(%323 : memref<1x32xf32, #tpu.memory_space<vmem>>)
      %c10_i32_210 = arith.constant 10 : i32
      %c0_i32_211 = arith.constant 0 : i32
      %c0_i32_212 = arith.constant 0 : i32
      %326 = tpu.memref_slice %arg3[%c0_i32_211, %c0_i32_212] : memref<64x32xf32, #tpu.memory_space<any>> -> memref<1x32xf32, #tpu.memory_space<any>>
      %c10_i32_213 = arith.constant 10 : i32
      %c0_i32_214 = arith.constant 0 : i32
      %327 = tpu.memref_slice %arg32[%c10_i32_213, %c0_i32_214] : memref<16x32xf32, #tpu.memory_space<vmem>> -> memref<1x32xf32, #tpu.memory_space<vmem>>
      %328 = tpu.memref_slice %arg34[%c10_i32_210] : memref<16x!tpu.dma_semaphore, #tpu.memory_space<semaphore_mem>> -> memref<1x!tpu.dma_semaphore, #tpu.memory_space<semaphore_mem>>
      %329 = tpu.memref_squeeze %328 : memref<1x!tpu.dma_semaphore, #tpu.memory_space<semaphore_mem>> -> memref<!tpu.dma_semaphore, #tpu.memory_space<semaphore_mem>>
      tpu.wait_dma2 semaphore(%329 : memref<!tpu.dma_semaphore, #tpu.memory_space<semaphore_mem>>) src(%326 : memref<1x32xf32, #tpu.memory_space<any>>) dst(%327 : memref<1x32xf32, #tpu.memory_space<vmem>>)
      %c11_i32_215 = arith.constant 11 : i32
      %c0_i32_216 = arith.constant 0 : i32
      %c0_i32_217 = arith.constant 0 : i32
      %330 = tpu.memref_slice %arg3[%c0_i32_216, %c0_i32_217] : memref<64x32xf32, #tpu.memory_space<any>> -> memref<1x32xf32, #tpu.memory_space<any>>
      %c11_i32_218 = arith.constant 11 : i32
      %c0_i32_219 = arith.constant 0 : i32
      %331 = tpu.memref_slice %arg32[%c11_i32_218, %c0_i32_219] : memref<16x32xf32, #tpu.memory_space<vmem>> -> memref<1x32xf32, #tpu.memory_space<vmem>>
      %332 = tpu.memref_slice %arg34[%c11_i32_215] : memref<16x!tpu.dma_semaphore, #tpu.memory_space<semaphore_mem>> -> memref<1x!tpu.dma_semaphore, #tpu.memory_space<semaphore_mem>>
      %333 = tpu.memref_squeeze %332 : memref<1x!tpu.dma_semaphore, #tpu.memory_space<semaphore_mem>> -> memref<!tpu.dma_semaphore, #tpu.memory_space<semaphore_mem>>
      tpu.wait_dma2 semaphore(%333 : memref<!tpu.dma_semaphore, #tpu.memory_space<semaphore_mem>>) src(%330 : memref<1x32xf32, #tpu.memory_space<any>>) dst(%331 : memref<1x32xf32, #tpu.memory_space<vmem>>)
      %c12_i32_220 = arith.constant 12 : i32
      %c0_i32_221 = arith.constant 0 : i32
      %c0_i32_222 = arith.constant 0 : i32
      %334 = tpu.memref_slice %arg3[%c0_i32_221, %c0_i32_222] : memref<64x32xf32, #tpu.memory_space<any>> -> memref<1x32xf32, #tpu.memory_space<any>>
      %c12_i32_223 = arith.constant 12 : i32
      %c0_i32_224 = arith.constant 0 : i32
      %335 = tpu.memref_slice %arg32[%c12_i32_223, %c0_i32_224] : memref<16x32xf32, #tpu.memory_space<vmem>> -> memref<1x32xf32, #tpu.memory_space<vmem>>
      %336 = tpu.memref_slice %arg34[%c12_i32_220] : memref<16x!tpu.dma_semaphore, #tpu.memory_space<semaphore_mem>> -> memref<1x!tpu.dma_semaphore, #tpu.memory_space<semaphore_mem>>
      %337 = tpu.memref_squeeze %336 : memref<1x!tpu.dma_semaphore, #tpu.memory_space<semaphore_mem>> -> memref<!tpu.dma_semaphore, #tpu.memory_space<semaphore_mem>>
      tpu.wait_dma2 semaphore(%337 : memref<!tpu.dma_semaphore, #tpu.memory_space<semaphore_mem>>) src(%334 : memref<1x32xf32, #tpu.memory_space<any>>) dst(%335 : memref<1x32xf32, #tpu.memory_space<vmem>>)
      %c13_i32_225 = arith.constant 13 : i32
      %c0_i32_226 = arith.constant 0 : i32
      %c0_i32_227 = arith.constant 0 : i32
      %338 = tpu.memref_slice %arg3[%c0_i32_226, %c0_i32_227] : memref<64x32xf32, #tpu.memory_space<any>> -> memref<1x32xf32, #tpu.memory_space<any>>
      %c13_i32_228 = arith.constant 13 : i32
      %c0_i32_229 = arith.constant 0 : i32
      %339 = tpu.memref_slice %arg32[%c13_i32_228, %c0_i32_229] : memref<16x32xf32, #tpu.memory_space<vmem>> -> memref<1x32xf32, #tpu.memory_space<vmem>>
      %340 = tpu.memref_slice %arg34[%c13_i32_225] : memref<16x!tpu.dma_semaphore, #tpu.memory_space<semaphore_mem>> -> memref<1x!tpu.dma_semaphore, #tpu.memory_space<semaphore_mem>>
      %341 = tpu.memref_squeeze %340 : memref<1x!tpu.dma_semaphore, #tpu.memory_space<semaphore_mem>> -> memref<!tpu.dma_semaphore, #tpu.memory_space<semaphore_mem>>
      tpu.wait_dma2 semaphore(%341 : memref<!tpu.dma_semaphore, #tpu.memory_space<semaphore_mem>>) src(%338 : memref<1x32xf32, #tpu.memory_space<any>>) dst(%339 : memref<1x32xf32, #tpu.memory_space<vmem>>)
      %c14_i32_230 = arith.constant 14 : i32
      %c0_i32_231 = arith.constant 0 : i32
      %c0_i32_232 = arith.constant 0 : i32
      %342 = tpu.memref_slice %arg3[%c0_i32_231, %c0_i32_232] : memref<64x32xf32, #tpu.memory_space<any>> -> memref<1x32xf32, #tpu.memory_space<any>>
      %c14_i32_233 = arith.constant 14 : i32
      %c0_i32_234 = arith.constant 0 : i32
      %343 = tpu.memref_slice %arg32[%c14_i32_233, %c0_i32_234] : memref<16x32xf32, #tpu.memory_space<vmem>> -> memref<1x32xf32, #tpu.memory_space<vmem>>
      %344 = tpu.memref_slice %arg34[%c14_i32_230] : memref<16x!tpu.dma_semaphore, #tpu.memory_space<semaphore_mem>> -> memref<1x!tpu.dma_semaphore, #tpu.memory_space<semaphore_mem>>
      %345 = tpu.memref_squeeze %344 : memref<1x!tpu.dma_semaphore, #tpu.memory_space<semaphore_mem>> -> memref<!tpu.dma_semaphore, #tpu.memory_space<semaphore_mem>>
      tpu.wait_dma2 semaphore(%345 : memref<!tpu.dma_semaphore, #tpu.memory_space<semaphore_mem>>) src(%342 : memref<1x32xf32, #tpu.memory_space<any>>) dst(%343 : memref<1x32xf32, #tpu.memory_space<vmem>>)
      %c15_i32_235 = arith.constant 15 : i32
      %c0_i32_236 = arith.constant 0 : i32
      %c0_i32_237 = arith.constant 0 : i32
      %346 = tpu.memref_slice %arg3[%c0_i32_236, %c0_i32_237] : memref<64x32xf32, #tpu.memory_space<any>> -> memref<1x32xf32, #tpu.memory_space<any>>
      %c15_i32_238 = arith.constant 15 : i32
      %c0_i32_239 = arith.constant 0 : i32
      %347 = tpu.memref_slice %arg32[%c15_i32_238, %c0_i32_239] : memref<16x32xf32, #tpu.memory_space<vmem>> -> memref<1x32xf32, #tpu.memory_space<vmem>>
      %348 = tpu.memref_slice %arg34[%c15_i32_235] : memref<16x!tpu.dma_semaphore, #tpu.memory_space<semaphore_mem>> -> memref<1x!tpu.dma_semaphore, #tpu.memory_space<semaphore_mem>>
      %349 = tpu.memref_squeeze %348 : memref<1x!tpu.dma_semaphore, #tpu.memory_space<semaphore_mem>> -> memref<!tpu.dma_semaphore, #tpu.memory_space<semaphore_mem>>
      tpu.wait_dma2 semaphore(%349 : memref<!tpu.dma_semaphore, #tpu.memory_space<semaphore_mem>>) src(%346 : memref<1x32xf32, #tpu.memory_space<any>>) dst(%347 : memref<1x32xf32, #tpu.memory_space<vmem>>)
      %c0_240 = arith.constant 0 : index
      %c0_241 = arith.constant 0 : index
      %350 = vector.load %arg4[%c0_240, %c0_241] : memref<16x48xf32, #tpu.memory_space<vmem>>, vector<16x48xf32>
      %c0_242 = arith.constant 0 : index
      %c0_243 = arith.constant 0 : index
      %351 = vector.load %arg5[%c0_242, %c0_243] : memref<48x32xf32, #tpu.memory_space<vmem>>, vector<48x32xf32>
      %cst_244 = arith.constant dense<0.000000e+00> : vector<16x32xf32>
      %352 = tpu.matmul %350, %351, %cst_244 {dimension_numbers = #tpu.dot_dimension_numbers<[1], [0], [0], [1], [0, 0, 1, 1], [], []>} : vector<16x48xf32>, vector<48x32xf32>, vector<16x32xf32> -> vector<16x32xf32>
      %c0_245 = arith.constant 0 : index
      %c0_246 = arith.constant 0 : index
      %353 = vector.load %arg6[%c0_245, %c0_246] : memref<1x32xf32, #tpu.memory_space<vmem>>, vector<1x32xf32>
      %354 = vector.broadcast %353 : vector<1x32xf32> to vector<16x32xf32>
      %355 = arith.addf %352, %354 : vector<16x32xf32>
      %c0_247 = arith.constant 0 : index
      %c0_248 = arith.constant 0 : index
      %356 = vector.load %arg7[%c0_247, %c0_248] : memref<16x24xf32, #tpu.memory_space<vmem>>, vector<16x24xf32>
      %c0_249 = arith.constant 0 : index
      %c0_250 = arith.constant 0 : index
      %357 = vector.load %arg8[%c0_249, %c0_250] : memref<24x32xf32, #tpu.memory_space<vmem>>, vector<24x32xf32>
      %cst_251 = arith.constant dense<0.000000e+00> : vector<16x32xf32>
      %358 = tpu.matmul %356, %357, %cst_251 {dimension_numbers = #tpu.dot_dimension_numbers<[1], [0], [0], [1], [0, 0, 1, 1], [], []>} : vector<16x24xf32>, vector<24x32xf32>, vector<16x32xf32> -> vector<16x32xf32>
      %c0_252 = arith.constant 0 : index
      %c0_253 = arith.constant 0 : index
      %359 = vector.load %arg9[%c0_252, %c0_253] : memref<1x32xf32, #tpu.memory_space<vmem>>, vector<1x32xf32>
      %360 = vector.broadcast %359 : vector<1x32xf32> to vector<16x32xf32>
      %361 = arith.addf %358, %360 : vector<16x32xf32>
      %c0_254 = arith.constant 0 : index
      %c0_255 = arith.constant 0 : index
      %362 = vector.load %arg32[%c0_254, %c0_255] : memref<16x32xf32, #tpu.memory_space<vmem>>, vector<16x32xf32>
      %c0_256 = arith.constant 0 : index
      %c0_257 = arith.constant 0 : index
      %363 = vector.load %arg10[%c0_256, %c0_257] : memref<32x32xf32, #tpu.memory_space<vmem>>, vector<32x32xf32>
      %cst_258 = arith.constant dense<0.000000e+00> : vector<16x32xf32>
      %364 = tpu.matmul %362, %363, %cst_258 {dimension_numbers = #tpu.dot_dimension_numbers<[1], [0], [0], [1], [0, 0, 1, 1], [], []>} : vector<16x32xf32>, vector<32x32xf32>, vector<16x32xf32> -> vector<16x32xf32>
      %c0_259 = arith.constant 0 : index
      %c0_260 = arith.constant 0 : index
      %365 = vector.load %arg11[%c0_259, %c0_260] : memref<32x32xf32, #tpu.memory_space<vmem>>, vector<32x32xf32>
      %cst_261 = arith.constant dense<0.000000e+00> : vector<16x32xf32>
      %366 = tpu.matmul %355, %365, %cst_261 {dimension_numbers = #tpu.dot_dimension_numbers<[1], [0], [0], [1], [0, 0, 1, 1], [], []>} : vector<16x32xf32>, vector<32x32xf32>, vector<16x32xf32> -> vector<16x32xf32>
      %367 = arith.addf %364, %366 : vector<16x32xf32>
      %c0_262 = arith.constant 0 : index
      %c0_263 = arith.constant 0 : index
      %368 = vector.load %arg12[%c0_262, %c0_263] : memref<32x32xf32, #tpu.memory_space<vmem>>, vector<32x32xf32>
      %cst_264 = arith.constant dense<0.000000e+00> : vector<16x32xf32>
      %369 = tpu.matmul %361, %368, %cst_264 {dimension_numbers = #tpu.dot_dimension_numbers<[1], [0], [0], [1], [0, 0, 1, 1], [], []>} : vector<16x32xf32>, vector<32x32xf32>, vector<16x32xf32> -> vector<16x32xf32>
      %370 = arith.addf %367, %369 : vector<16x32xf32>
      %c0_265 = arith.constant 0 : index
      %c0_266 = arith.constant 0 : index
      %371 = vector.load %arg13[%c0_265, %c0_266] : memref<1x32xf32, #tpu.memory_space<vmem>>, vector<1x32xf32>
      %372 = vector.broadcast %371 : vector<1x32xf32> to vector<16x32xf32>
      %373 = arith.addf %370, %372 : vector<16x32xf32>
      %c0_267 = arith.constant 0 : index
      %c0_268 = arith.constant 0 : index
      %374 = vector.load %arg31[%c0_267, %c0_268] : memref<16x32xf32, #tpu.memory_space<vmem>>, vector<16x32xf32>
      tpu.vector_store %arg31[%c0_267, %c0_268], %373 {strides = array<i32>} : memref<16x32xf32, #tpu.memory_space<vmem>>, vector<16x32xf32>,
    } else {
    }
    %c0 = arith.constant 0 : index
    %c0_1 = arith.constant 0 : index
    %3 = vector.load %arg31[%c0, %c0_1] : memref<16x32xf32, #tpu.memory_space<vmem>>, vector<16x32xf32>
    %c0_2 = arith.constant 0 : index
    %c0_3 = arith.constant 0 : index
    %c0_4 = arith.constant 0 : index
    %4 = vector.load %arg14[%c0_2, %c0_3, %c0_4] : memref<1x32x32xf32, #tpu.memory_space<vmem>>, vector<1x32x32xf32>
    %5 = vector.shape_cast %4 : vector<1x32x32xf32> to vector<32x32xf32>
    %cst = arith.constant dense<0.000000e+00> : vector<16x32xf32>
    %6 = tpu.matmul %3, %5, %cst {dimension_numbers = #tpu.dot_dimension_numbers<[1], [0], [0], [1], [0, 0, 1, 1], [], []>} : vector<16x32xf32>, vector<32x32xf32>, vector<16x32xf32> -> vector<16x32xf32>
    %c0_5 = arith.constant 0 : index
    %c0_6 = arith.constant 0 : index
    %c0_7 = arith.constant 0 : index
    %7 = vector.load %arg15[%c0_5, %c0_6, %c0_7] : memref<1x1x32xf32, #tpu.memory_space<vmem>>, vector<1x1x32xf32>
    %8 = vector.shape_cast %7 : vector<1x1x32xf32> to vector<1x32xf32>
    %9 = vector.broadcast %8 : vector<1x32xf32> to vector<16x32xf32>
    %10 = arith.addf %6, %9 : vector<16x32xf32>
    %cst_8 = arith.constant 2.500000e-01 : f32
    %11 = vector.broadcast %cst_8 : f32 to vector<16x32xf32>
    %12 = arith.mulf %10, %11 : vector<16x32xf32>
    %c0_9 = arith.constant 0 : index
    %c0_10 = arith.constant 0 : index
    %c0_11 = arith.constant 0 : index
    %13 = vector.load %arg16[%c0_9, %c0_10, %c0_11] : memref<1x32x32xf32, #tpu.memory_space<vmem>>, vector<1x32x32xf32>
    %14 = vector.shape_cast %13 : vector<1x32x32xf32> to vector<32x32xf32>
    %cst_12 = arith.constant dense<0.000000e+00> : vector<16x32xf32>
    %15 = tpu.matmul %3, %14, %cst_12 {dimension_numbers = #tpu.dot_dimension_numbers<[1], [0], [0], [1], [0, 0, 1, 1], [], []>} : vector<16x32xf32>, vector<32x32xf32>, vector<16x32xf32> -> vector<16x32xf32>
    %c0_13 = arith.constant 0 : index
    %c0_14 = arith.constant 0 : index
    %c0_15 = arith.constant 0 : index
    %16 = vector.load %arg17[%c0_13, %c0_14, %c0_15] : memref<1x1x32xf32, #tpu.memory_space<vmem>>, vector<1x1x32xf32>
    %17 = vector.shape_cast %16 : vector<1x1x32xf32> to vector<1x32xf32>
    %18 = vector.broadcast %17 : vector<1x32xf32> to vector<16x32xf32>
    %19 = arith.addf %15, %18 : vector<16x32xf32>
    %c0_16 = arith.constant 0 : index
    %c0_17 = arith.constant 0 : index
    %c0_18 = arith.constant 0 : index
    %20 = vector.load %arg18[%c0_16, %c0_17, %c0_18] : memref<1x32x32xf32, #tpu.memory_space<vmem>>, vector<1x32x32xf32>
    %21 = vector.shape_cast %20 : vector<1x32x32xf32> to vector<32x32xf32>
    %cst_19 = arith.constant dense<0.000000e+00> : vector<16x32xf32>
    %22 = tpu.matmul %3, %21, %cst_19 {dimension_numbers = #tpu.dot_dimension_numbers<[1], [0], [0], [1], [0, 0, 1, 1], [], []>} : vector<16x32xf32>, vector<32x32xf32>, vector<16x32xf32> -> vector<16x32xf32>
    %c0_20 = arith.constant 0 : index
    %c0_21 = arith.constant 0 : index
    %c0_22 = arith.constant 0 : index
    %23 = vector.load %arg19[%c0_20, %c0_21, %c0_22] : memref<1x1x32xf32, #tpu.memory_space<vmem>>, vector<1x1x32xf32>
    %24 = vector.shape_cast %23 : vector<1x1x32xf32> to vector<1x32xf32>
    %25 = vector.broadcast %24 : vector<1x32xf32> to vector<16x32xf32>
    %26 = arith.addf %22, %25 : vector<16x32xf32>
    %27 = vector.extract_strided_slice %12 {offsets = [0, 0], sizes = [8, 16], strides = [1, 1]} : vector<16x32xf32> to vector<8x16xf32>
    %28 = vector.extract_strided_slice %19 {offsets = [0, 0], sizes = [8, 16], strides = [1, 1]} : vector<16x32xf32> to vector<8x16xf32>
    %29 = vector.extract_strided_slice %26 {offsets = [0, 0], sizes = [8, 16], strides = [1, 1]} : vector<16x32xf32> to vector<8x16xf32>
    "tpu.trace_start"() <{level = 10 : i32, message = "sd,td->st"}> : () -> ()
    %cst_23 = arith.constant dense<0.000000e+00> : vector<8x8xf32>
    %30 = tpu.matmul %27, %28, %cst_23 {dimension_numbers = #tpu.dot_dimension_numbers<[1], [1], [0], [0], [0, 0, 1, 0], [], []>} : vector<8x16xf32>, vector<8x16xf32>, vector<8x8xf32> -> vector<8x8xf32>
    "tpu.trace_stop"() : () -> ()
    %cst_24 = arith.constant dense<0xFF800000> : vector<8xf32>
    %31 = vector.multi_reduction <maximumf>, %30, %cst_24 [1] : vector<8x8xf32> to vector<8xf32>
    %32 = vector.shape_cast %31 : vector<8xf32> to vector<8x1xf32>
    %33 = vector.broadcast %32 : vector<8x1xf32> to vector<8x8xf32>
    %34 = arith.subf %30, %33 : vector<8x8xf32>
    %35 = math.exp %34 : vector<8x8xf32>
    %cst_25 = arith.constant dense<0.000000e+00> : vector<8xf32>
    %36 = vector.multi_reduction <add>, %35, %cst_25 [1] : vector<8x8xf32> to vector<8xf32>
    %37 = vector.shape_cast %36 : vector<8xf32> to vector<8x1xf32>
    %38 = tpu.reciprocal %37 {approx = true} : vector<8x1xf32> -> vector<8x1xf32>
    %39 = vector.broadcast %38 : vector<8x1xf32> to vector<8x8xf32>
    %40 = arith.mulf %35, %39 : vector<8x8xf32>
    %cst_26 = arith.constant dense<0.000000e+00> : vector<8x16xf32>
    %41 = tpu.matmul %40, %29, %cst_26 {dimension_numbers = #tpu.dot_dimension_numbers<[1], [0], [0], [1], [0, 0, 1, 1], [], []>} : vector<8x8xf32>, vector<8x16xf32>, vector<8x16xf32> -> vector<8x16xf32>
    %c0_27 = arith.constant 0 : index
    %c0_28 = arith.constant 0 : index
    %42 = vector.load %arg33[%c0_27, %c0_28] : memref<16x32xf32, #tpu.memory_space<vmem>>, vector<8x16xf32>
    tpu.vector_store %arg33[%c0_27, %c0_28], %41 {strides = array<i32>} : memref<16x32xf32, #tpu.memory_space<vmem>>, vector<8x16xf32>,
    %43 = vector.extract_strided_slice %12 {offsets = [0, 16], sizes = [8, 16], strides = [1, 1]} : vector<16x32xf32> to vector<8x16xf32>
    %44 = vector.extract_strided_slice %19 {offsets = [0, 16], sizes = [8, 16], strides = [1, 1]} : vector<16x32xf32> to vector<8x16xf32>
    %45 = vector.extract_strided_slice %26 {offsets = [0, 16], sizes = [8, 16], strides = [1, 1]} : vector<16x32xf32> to vector<8x16xf32>
    "tpu.trace_start"() <{level = 10 : i32, message = "sd,td->st"}> : () -> ()
    %cst_29 = arith.constant dense<0.000000e+00> : vector<8x8xf32>
    %46 = tpu.matmul %43, %44, %cst_29 {dimension_numbers = #tpu.dot_dimension_numbers<[1], [1], [0], [0], [0, 0, 1, 0], [], []>} : vector<8x16xf32>, vector<8x16xf32>, vector<8x8xf32> -> vector<8x8xf32>
    "tpu.trace_stop"() : () -> ()
    %cst_30 = arith.constant dense<0xFF800000> : vector<8xf32>
    %47 = vector.multi_reduction <maximumf>, %46, %cst_30 [1] : vector<8x8xf32> to vector<8xf32>
    %48 = vector.shape_cast %47 : vector<8xf32> to vector<8x1xf32>
    %49 = vector.broadcast %48 : vector<8x1xf32> to vector<8x8xf32>
    %50 = arith.subf %46, %49 : vector<8x8xf32>
    %51 = math.exp %50 : vector<8x8xf32>
    %cst_31 = arith.constant dense<0.000000e+00> : vector<8xf32>
    %52 = vector.multi_reduction <add>, %51, %cst_31 [1] : vector<8x8xf32> to vector<8xf32>
    %53 = vector.shape_cast %52 : vector<8xf32> to vector<8x1xf32>
    %54 = tpu.reciprocal %53 {approx = true} : vector<8x1xf32> -> vector<8x1xf32>
    %55 = vector.broadcast %54 : vector<8x1xf32> to vector<8x8xf32>
    %56 = arith.mulf %51, %55 : vector<8x8xf32>
    %cst_32 = arith.constant dense<0.000000e+00> : vector<8x16xf32>
    %57 = tpu.matmul %56, %45, %cst_32 {dimension_numbers = #tpu.dot_dimension_numbers<[1], [0], [0], [1], [0, 0, 1, 1], [], []>} : vector<8x8xf32>, vector<8x16xf32>, vector<8x16xf32> -> vector<8x16xf32>
    %c0_33 = arith.constant 0 : index
    %c16 = arith.constant 16 : index
    %58 = vector.load %arg33[%c0_33, %c16] : memref<16x32xf32, #tpu.memory_space<vmem>>, vector<8x16xf32>
    tpu.vector_store %arg33[%c0_33, %c16], %57 {strides = array<i32>} : memref<16x32xf32, #tpu.memory_space<vmem>>, vector<8x16xf32>,
    %59 = vector.extract_strided_slice %12 {offsets = [8, 0], sizes = [8, 16], strides = [1, 1]} : vector<16x32xf32> to vector<8x16xf32>
    %60 = vector.extract_strided_slice %19 {offsets = [8, 0], sizes = [8, 16], strides = [1, 1]} : vector<16x32xf32> to vector<8x16xf32>
    %61 = vector.extract_strided_slice %26 {offsets = [8, 0], sizes = [8, 16], strides = [1, 1]} : vector<16x32xf32> to vector<8x16xf32>
    "tpu.trace_start"() <{level = 10 : i32, message = "sd,td->st"}> : () -> ()
    %cst_34 = arith.constant dense<0.000000e+00> : vector<8x8xf32>
    %62 = tpu.matmul %59, %60, %cst_34 {dimension_numbers = #tpu.dot_dimension_numbers<[1], [1], [0], [0], [0, 0, 1, 0], [], []>} : vector<8x16xf32>, vector<8x16xf32>, vector<8x8xf32> -> vector<8x8xf32>
    "tpu.trace_stop"() : () -> ()
    %cst_35 = arith.constant dense<0xFF800000> : vector<8xf32>
    %63 = vector.multi_reduction <maximumf>, %62, %cst_35 [1] : vector<8x8xf32> to vector<8xf32>
    %64 = vector.shape_cast %63 : vector<8xf32> to vector<8x1xf32>
    %65 = vector.broadcast %64 : vector<8x1xf32> to vector<8x8xf32>
    %66 = arith.subf %62, %65 : vector<8x8xf32>
    %67 = math.exp %66 : vector<8x8xf32>
    %cst_36 = arith.constant dense<0.000000e+00> : vector<8xf32>
    %68 = vector.multi_reduction <add>, %67, %cst_36 [1] : vector<8x8xf32> to vector<8xf32>
    %69 = vector.shape_cast %68 : vector<8xf32> to vector<8x1xf32>
    %70 = tpu.reciprocal %69 {approx = true} : vector<8x1xf32> -> vector<8x1xf32>
    %71 = vector.broadcast %70 : vector<8x1xf32> to vector<8x8xf32>
    %72 = arith.mulf %67, %71 : vector<8x8xf32>
    %cst_37 = arith.constant dense<0.000000e+00> : vector<8x16xf32>
    %73 = tpu.matmul %72, %61, %cst_37 {dimension_numbers = #tpu.dot_dimension_numbers<[1], [0], [0], [1], [0, 0, 1, 1], [], []>} : vector<8x8xf32>, vector<8x16xf32>, vector<8x16xf32> -> vector<8x16xf32>
    %c8 = arith.constant 8 : index
    %c0_38 = arith.constant 0 : index
    %74 = vector.load %arg33[%c8, %c0_38] : memref<16x32xf32, #tpu.memory_space<vmem>>, vector<8x16xf32>
    tpu.vector_store %arg33[%c8, %c0_38], %73 {strides = array<i32>} : memref<16x32xf32, #tpu.memory_space<vmem>>, vector<8x16xf32>,
    %75 = vector.extract_strided_slice %12 {offsets = [8, 16], sizes = [8, 16], strides = [1, 1]} : vector<16x32xf32> to vector<8x16xf32>
    %76 = vector.extract_strided_slice %19 {offsets = [8, 16], sizes = [8, 16], strides = [1, 1]} : vector<16x32xf32> to vector<8x16xf32>
    %77 = vector.extract_strided_slice %26 {offsets = [8, 16], sizes = [8, 16], strides = [1, 1]} : vector<16x32xf32> to vector<8x16xf32>
    "tpu.trace_start"() <{level = 10 : i32, message = "sd,td->st"}> : () -> ()
    %cst_39 = arith.constant dense<0.000000e+00> : vector<8x8xf32>
    %78 = tpu.matmul %75, %76, %cst_39 {dimension_numbers = #tpu.dot_dimension_numbers<[1], [1], [0], [0], [0, 0, 1, 0], [], []>} : vector<8x16xf32>, vector<8x16xf32>, vector<8x8xf32> -> vector<8x8xf32>
    "tpu.trace_stop"() : () -> ()
    %cst_40 = arith.constant dense<0xFF800000> : vector<8xf32>
    %79 = vector.multi_reduction <maximumf>, %78, %cst_40 [1] : vector<8x8xf32> to vector<8xf32>
    %80 = vector.shape_cast %79 : vector<8xf32> to vector<8x1xf32>
    %81 = vector.broadcast %80 : vector<8x1xf32> to vector<8x8xf32>
    %82 = arith.subf %78, %81 : vector<8x8xf32>
    %83 = math.exp %82 : vector<8x8xf32>
    %cst_41 = arith.constant dense<0.000000e+00> : vector<8xf32>
    %84 = vector.multi_reduction <add>, %83, %cst_41 [1] : vector<8x8xf32> to vector<8xf32>
    %85 = vector.shape_cast %84 : vector<8xf32> to vector<8x1xf32>
    %86 = tpu.reciprocal %85 {approx = true} : vector<8x1xf32> -> vector<8x1xf32>
    %87 = vector.broadcast %86 : vector<8x1xf32> to vector<8x8xf32>
    %88 = arith.mulf %83, %87 : vector<8x8xf32>
    %cst_42 = arith.constant dense<0.000000e+00> : vector<8x16xf32>
    %89 = tpu.matmul %88, %77, %cst_42 {dimension_numbers = #tpu.dot_dimension_numbers<[1], [0], [0], [1], [0, 0, 1, 1], [], []>} : vector<8x8xf32>, vector<8x16xf32>, vector<8x16xf32> -> vector<8x16xf32>
    %c8_43 = arith.constant 8 : index
    %c16_44 = arith.constant 16 : index
    %90 = vector.load %arg33[%c8_43, %c16_44] : memref<16x32xf32, #tpu.memory_space<vmem>>, vector<8x16xf32>
    tpu.vector_store %arg33[%c8_43, %c16_44], %89 {strides = array<i32>} : memref<16x32xf32, #tpu.memory_space<vmem>>, vector<8x16xf32>,
    %c0_45 = arith.constant 0 : index
    %c0_46 = arith.constant 0 : index
    %91 = vector.load %arg33[%c0_45, %c0_46] : memref<16x32xf32, #tpu.memory_space<vmem>>, vector<16x32xf32>
    %c0_47 = arith.constant 0 : index
    %c0_48 = arith.constant 0 : index
    %c0_49 = arith.constant 0 : index
    %92 = vector.load %arg20[%c0_47, %c0_48, %c0_49] : memref<1x32x32xf32, #tpu.memory_space<vmem>>, vector<1x32x32xf32>
    %93 = vector.shape_cast %92 : vector<1x32x32xf32> to vector<32x32xf32>
    %cst_50 = arith.constant dense<0.000000e+00> : vector<16x32xf32>
    %94 = tpu.matmul %91, %93, %cst_50 {dimension_numbers = #tpu.dot_dimension_numbers<[1], [0], [0], [1], [0, 0, 1, 1], [], []>} : vector<16x32xf32>, vector<32x32xf32>, vector<16x32xf32> -> vector<16x32xf32>
    %c0_51 = arith.constant 0 : index
    %c0_52 = arith.constant 0 : index
    %c0_53 = arith.constant 0 : index
    %95 = vector.load %arg21[%c0_51, %c0_52, %c0_53] : memref<1x1x32xf32, #tpu.memory_space<vmem>>, vector<1x1x32xf32>
    %96 = vector.shape_cast %95 : vector<1x1x32xf32> to vector<1x32xf32>
    %97 = vector.broadcast %96 : vector<1x32xf32> to vector<16x32xf32>
    %98 = arith.addf %94, %97 : vector<16x32xf32>
    %99 = arith.addf %3, %98 : vector<16x32xf32>
    %c0_54 = arith.constant 0 : index
    %c0_55 = arith.constant 0 : index
    %c0_56 = arith.constant 0 : index
    %100 = vector.load %arg22[%c0_54, %c0_55, %c0_56] : memref<1x1x32xf32, #tpu.memory_space<vmem>>, vector<1x1x32xf32>
    %101 = vector.shape_cast %100 : vector<1x1x32xf32> to vector<1x32xf32>
    %c0_57 = arith.constant 0 : index
    %c0_58 = arith.constant 0 : index
    %c0_59 = arith.constant 0 : index
    %102 = vector.load %arg23[%c0_57, %c0_58, %c0_59] : memref<1x1x32xf32, #tpu.memory_space<vmem>>, vector<1x1x32xf32>
    %103 = vector.shape_cast %102 : vector<1x1x32xf32> to vector<1x32xf32>
    %cst_60 = arith.constant dense<0.000000e+00> : vector<16xf32>
    %104 = vector.multi_reduction <add>, %99, %cst_60 [1] : vector<16x32xf32> to vector<16xf32>
    %105 = vector.shape_cast %104 : vector<16xf32> to vector<16x1xf32>
    %cst_61 = arith.constant 3.200000e+01 : f32
    %106 = vector.broadcast %cst_61 : f32 to vector<16x1xf32>
    %107 = arith.divf %105, %106 : vector<16x1xf32>
    %108 = vector.broadcast %107 : vector<16x1xf32> to vector<16x32xf32>
    %109 = arith.subf %99, %108 : vector<16x32xf32>
    %110 = arith.mulf %109, %109 : vector<16x32xf32>
    %cst_62 = arith.constant dense<0.000000e+00> : vector<16xf32>
    %111 = vector.multi_reduction <add>, %110, %cst_62 [1] : vector<16x32xf32> to vector<16xf32>
    %112 = vector.shape_cast %111 : vector<16xf32> to vector<16x1xf32>
    %cst_63 = arith.constant 3.200000e+01 : f32
    %113 = vector.broadcast %cst_63 : f32 to vector<16x1xf32>
    %114 = arith.divf %112, %113 : vector<16x1xf32>
    %115 = vector.broadcast %107 : vector<16x1xf32> to vector<16x32xf32>
    %116 = arith.subf %99, %115 : vector<16x32xf32>
    %cst_64 = arith.constant 9.99999974E-6 : f32
    %117 = vector.broadcast %cst_64 : f32 to vector<16x1xf32>
    %118 = arith.addf %114, %117 : vector<16x1xf32>
    %119 = math.rsqrt %118 : vector<16x1xf32>
    %120 = vector.broadcast %119 : vector<16x1xf32> to vector<16x32xf32>
    %121 = arith.mulf %116, %120 : vector<16x32xf32>
    %122 = vector.broadcast %101 : vector<1x32xf32> to vector<16x32xf32>
    %123 = arith.mulf %121, %122 : vector<16x32xf32>
    %124 = vector.broadcast %103 : vector<1x32xf32> to vector<16x32xf32>
    %125 = arith.addf %123, %124 : vector<16x32xf32>
    %c0_65 = arith.constant 0 : index
    %c0_66 = arith.constant 0 : index
    %c0_67 = arith.constant 0 : index
    %126 = vector.load %arg24[%c0_65, %c0_66, %c0_67] : memref<1x32x64xf32, #tpu.memory_space<vmem>>, vector<1x32x64xf32>
    %127 = vector.shape_cast %126 : vector<1x32x64xf32> to vector<32x64xf32>
    %cst_68 = arith.constant dense<0.000000e+00> : vector<16x64xf32>
    %128 = tpu.matmul %125, %127, %cst_68 {dimension_numbers = #tpu.dot_dimension_numbers<[1], [0], [0], [1], [0, 0, 1, 1], [], []>} : vector<16x32xf32>, vector<32x64xf32>, vector<16x64xf32> -> vector<16x64xf32>
    %c0_69 = arith.constant 0 : index
    %c0_70 = arith.constant 0 : index
    %c0_71 = arith.constant 0 : index
    %129 = vector.load %arg25[%c0_69, %c0_70, %c0_71] : memref<1x1x64xf32, #tpu.memory_space<vmem>>, vector<1x1x64xf32>
    %130 = vector.shape_cast %129 : vector<1x1x64xf32> to vector<1x64xf32>
    %131 = vector.broadcast %130 : vector<1x64xf32> to vector<16x64xf32>
    %132 = arith.addf %128, %131 : vector<16x64xf32>
    %cst_72 = arith.constant 0.000000e+00 : f32
    %133 = vector.broadcast %cst_72 : f32 to vector<16x64xf32>
    %134 = arith.maximumf %132, %133 : vector<16x64xf32>
    %c0_73 = arith.constant 0 : index
    %c0_74 = arith.constant 0 : index
    %c0_75 = arith.constant 0 : index
    %135 = vector.load %arg26[%c0_73, %c0_74, %c0_75] : memref<1x64x32xf32, #tpu.memory_space<vmem>>, vector<1x64x32xf32>
    %136 = vector.shape_cast %135 : vector<1x64x32xf32> to vector<64x32xf32>
    %cst_76 = arith.constant dense<0.000000e+00> : vector<16x32xf32>
    %137 = tpu.matmul %134, %136, %cst_76 {dimension_numbers = #tpu.dot_dimension_numbers<[1], [0], [0], [1], [0, 0, 1, 1], [], []>} : vector<16x64xf32>, vector<64x32xf32>, vector<16x32xf32> -> vector<16x32xf32>
    %c0_77 = arith.constant 0 : index
    %c0_78 = arith.constant 0 : index
    %c0_79 = arith.constant 0 : index
    %138 = vector.load %arg27[%c0_77, %c0_78, %c0_79] : memref<1x1x32xf32, #tpu.memory_space<vmem>>, vector<1x1x32xf32>
    %139 = vector.shape_cast %138 : vector<1x1x32xf32> to vector<1x32xf32>
    %140 = vector.broadcast %139 : vector<1x32xf32> to vector<16x32xf32>
    %141 = arith.addf %137, %140 : vector<16x32xf32>
    %142 = arith.addf %125, %141 : vector<16x32xf32>
    %c0_80 = arith.constant 0 : index
    %c0_81 = arith.constant 0 : index
    %c0_82 = arith.constant 0 : index
    %143 = vector.load %arg28[%c0_80, %c0_81, %c0_82] : memref<1x1x32xf32, #tpu.memory_space<vmem>>, vector<1x1x32xf32>
    %144 = vector.shape_cast %143 : vector<1x1x32xf32> to vector<1x32xf32>
    %c0_83 = arith.constant 0 : index
    %c0_84 = arith.constant 0 : index
    %c0_85 = arith.constant 0 : index
    %145 = vector.load %arg29[%c0_83, %c0_84, %c0_85] : memref<1x1x32xf32, #tpu.memory_space<vmem>>, vector<1x1x32xf32>
    %146 = vector.shape_cast %145 : vector<1x1x32xf32> to vector<1x32xf32>
    %cst_86 = arith.constant dense<0.000000e+00> : vector<16xf32>
    %147 = vector.multi_reduction <add>, %142, %cst_86 [1] : vector<16x32xf32> to vector<16xf32>
    %148 = vector.shape_cast %147 : vector<16xf32> to vector<16x1xf32>
    %cst_87 = arith.constant 3.200000e+01 : f32
    %149 = vector.broadcast %cst_87 : f32 to vector<16x1xf32>
    %150 = arith.divf %148, %149 : vector<16x1xf32>
    %151 = vector.broadcast %150 : vector<16x1xf32> to vector<16x32xf32>
    %152 = arith.subf %142, %151 : vector<16x32xf32>
    %153 = arith.mulf %152, %152 : vector<16x32xf32>
    %cst_88 = arith.constant dense<0.000000e+00> : vector<16xf32>
    %154 = vector.multi_reduction <add>, %153, %cst_88 [1] : vector<16x32xf32> to vector<16xf32>
    %155 = vector.shape_cast %154 : vector<16xf32> to vector<16x1xf32>
    %cst_89 = arith.constant 3.200000e+01 : f32
    %156 = vector.broadcast %cst_89 : f32 to vector<16x1xf32>
    %157 = arith.divf %155, %156 : vector<16x1xf32>
    %158 = vector.broadcast %150 : vector<16x1xf32> to vector<16x32xf32>
    %159 = arith.subf %142, %158 : vector<16x32xf32>
    %cst_90 = arith.constant 9.99999974E-6 : f32
    %160 = vector.broadcast %cst_90 : f32 to vector<16x1xf32>
    %161 = arith.addf %157, %160 : vector<16x1xf32>
    %162 = math.rsqrt %161 : vector<16x1xf32>
    %163 = vector.broadcast %162 : vector<16x1xf32> to vector<16x32xf32>
    %164 = arith.mulf %159, %163 : vector<16x32xf32>
    %165 = vector.broadcast %144 : vector<1x32xf32> to vector<16x32xf32>
    %166 = arith.mulf %164, %165 : vector<16x32xf32>
    %167 = vector.broadcast %146 : vector<1x32xf32> to vector<16x32xf32>
    %168 = arith.addf %166, %167 : vector<16x32xf32>
    %c0_91 = arith.constant 0 : index
    %c0_92 = arith.constant 0 : index
    %169 = vector.load %arg31[%c0_91, %c0_92] : memref<16x32xf32, #tpu.memory_space<vmem>>, vector<16x32xf32>
    tpu.vector_store %arg31[%c0_91, %c0_92], %168 {strides = array<i32>} : memref<16x32xf32, #tpu.memory_space<vmem>>, vector<16x32xf32>,
    %c1_i32 = arith.constant 1 : i32
    %170 = arith.cmpi eq, %arg1, %c1_i32 : i32
    %171 = arith.extui %170 : i1 to i32
    %c0_i32_93 = arith.constant 0 : i32
    %172 = arith.cmpi ne, %171, %c0_i32_93 : i32
    scf.if %172 {
      %c0_94 = arith.constant 0 : index
      %c0_95 = arith.constant 0 : index
      %173 = vector.load %arg30[%c0_94, %c0_95] : memref<16x32xf32, #tpu.memory_space<vmem>>, vector<16x32xf32>
      tpu.vector_store %arg30[%c0_94, %c0_95], %168 {strides = array<i32>} : memref<16x32xf32, #tpu.memory_space<vmem>>, vector<16x32xf32>,
    } else {
    }
    return
  }
  func.func @transform_1(%arg0: i32, %arg1: i32, %arg2: memref<16xi32, #tpu.memory_space<smem>>) -> (i32, i32) {
    %c0_i32 = arith.constant 0 : i32
    %c0_i32_0 = arith.constant 0 : i32
    return %arg0, %c0_i32 : i32, i32
  }
  func.func @transform_2(%arg0: i32, %arg1: i32, %arg2: memref<16xi32, #tpu.memory_space<smem>>) -> (i32, i32) {
    %c0_i32 = arith.constant 0 : i32
    %c0_i32_0 = arith.constant 0 : i32
    %c0_i32_1 = arith.constant 0 : i32
    return %c0_i32, %c0_i32_0 : i32, i32
  }
  func.func @transform_3(%arg0: i32, %arg1: i32, %arg2: memref<16xi32, #tpu.memory_space<smem>>) -> (i32, i32) {
    %c0_i32 = arith.constant 0 : i32
    %c0_i32_0 = arith.constant 0 : i32
    %c0_i32_1 = arith.constant 0 : i32
    return %c0_i32, %c0_i32_0 : i32, i32
  }
  func.func @transform_4(%arg0: i32, %arg1: i32, %arg2: memref<16xi32, #tpu.memory_space<smem>>) -> (i32, i32) {
    %c0_i32 = arith.constant 0 : i32
    %c0_i32_0 = arith.constant 0 : i32
    return %arg0, %c0_i32 : i32, i32
  }
  func.func @transform_5(%arg0: i32, %arg1: i32, %arg2: memref<16xi32, #tpu.memory_space<smem>>) -> (i32, i32) {
    %c0_i32 = arith.constant 0 : i32
    %c0_i32_0 = arith.constant 0 : i32
    %c0_i32_1 = arith.constant 0 : i32
    return %c0_i32, %c0_i32_0 : i32, i32
  }
  func.func @transform_6(%arg0: i32, %arg1: i32, %arg2: memref<16xi32, #tpu.memory_space<smem>>) -> (i32, i32) {
    %c0_i32 = arith.constant 0 : i32
    %c0_i32_0 = arith.constant 0 : i32
    %c0_i32_1 = arith.constant 0 : i32
    return %c0_i32, %c0_i32_0 : i32, i32
  }
  func.func @transform_7(%arg0: i32, %arg1: i32, %arg2: memref<16xi32, #tpu.memory_space<smem>>) -> (i32, i32) {
    %c0_i32 = arith.constant 0 : i32
    %c0_i32_0 = arith.constant 0 : i32
    %c0_i32_1 = arith.constant 0 : i32
    return %c0_i32, %c0_i32_0 : i32, i32
  }
  func.func @transform_8(%arg0: i32, %arg1: i32, %arg2: memref<16xi32, #tpu.memory_space<smem>>) -> (i32, i32) {
    %c0_i32 = arith.constant 0 : i32
    %c0_i32_0 = arith.constant 0 : i32
    %c0_i32_1 = arith.constant 0 : i32
    return %c0_i32, %c0_i32_0 : i32, i32
  }
  func.func @transform_9(%arg0: i32, %arg1: i32, %arg2: memref<16xi32, #tpu.memory_space<smem>>) -> (i32, i32) {
    %c0_i32 = arith.constant 0 : i32
    %c0_i32_0 = arith.constant 0 : i32
    %c0_i32_1 = arith.constant 0 : i32
    return %c0_i32, %c0_i32_0 : i32, i32
  }
  func.func @transform_10(%arg0: i32, %arg1: i32, %arg2: memref<16xi32, #tpu.memory_space<smem>>) -> (i32, i32) {
    %c0_i32 = arith.constant 0 : i32
    %c0_i32_0 = arith.constant 0 : i32
    %c0_i32_1 = arith.constant 0 : i32
    return %c0_i32, %c0_i32_0 : i32, i32
  }
  func.func @transform_11(%arg0: i32, %arg1: i32, %arg2: memref<16xi32, #tpu.memory_space<smem>>) -> (i32, i32, i32) {
    %c0_i32 = arith.constant 0 : i32
    %c0_i32_0 = arith.constant 0 : i32
    %c0_i32_1 = arith.constant 0 : i32
    return %arg1, %c0_i32, %c0_i32_0 : i32, i32, i32
  }
  func.func @transform_12(%arg0: i32, %arg1: i32, %arg2: memref<16xi32, #tpu.memory_space<smem>>) -> (i32, i32, i32) {
    %c0_i32 = arith.constant 0 : i32
    %c0_i32_0 = arith.constant 0 : i32
    %c0_i32_1 = arith.constant 0 : i32
    return %arg1, %c0_i32, %c0_i32_0 : i32, i32, i32
  }
  func.func @transform_13(%arg0: i32, %arg1: i32, %arg2: memref<16xi32, #tpu.memory_space<smem>>) -> (i32, i32, i32) {
    %c0_i32 = arith.constant 0 : i32
    %c0_i32_0 = arith.constant 0 : i32
    %c0_i32_1 = arith.constant 0 : i32
    return %arg1, %c0_i32, %c0_i32_0 : i32, i32, i32
  }
  func.func @transform_14(%arg0: i32, %arg1: i32, %arg2: memref<16xi32, #tpu.memory_space<smem>>) -> (i32, i32, i32) {
    %c0_i32 = arith.constant 0 : i32
    %c0_i32_0 = arith.constant 0 : i32
    %c0_i32_1 = arith.constant 0 : i32
    return %arg1, %c0_i32, %c0_i32_0 : i32, i32, i32
  }
  func.func @transform_15(%arg0: i32, %arg1: i32, %arg2: memref<16xi32, #tpu.memory_space<smem>>) -> (i32, i32, i32) {
    %c0_i32 = arith.constant 0 : i32
    %c0_i32_0 = arith.constant 0 : i32
    %c0_i32_1 = arith.constant 0 : i32
    return %arg1, %c0_i32, %c0_i32_0 : i32, i32, i32
  }
  func.func @transform_16(%arg0: i32, %arg1: i32, %arg2: memref<16xi32, #tpu.memory_space<smem>>) -> (i32, i32, i32) {
    %c0_i32 = arith.constant 0 : i32
    %c0_i32_0 = arith.constant 0 : i32
    %c0_i32_1 = arith.constant 0 : i32
    return %arg1, %c0_i32, %c0_i32_0 : i32, i32, i32
  }
  func.func @transform_17(%arg0: i32, %arg1: i32, %arg2: memref<16xi32, #tpu.memory_space<smem>>) -> (i32, i32, i32) {
    %c0_i32 = arith.constant 0 : i32
    %c0_i32_0 = arith.constant 0 : i32
    %c0_i32_1 = arith.constant 0 : i32
    return %arg1, %c0_i32, %c0_i32_0 : i32, i32, i32
  }
  func.func @transform_18(%arg0: i32, %arg1: i32, %arg2: memref<16xi32, #tpu.memory_space<smem>>) -> (i32, i32, i32) {
    %c0_i32 = arith.constant 0 : i32
    %c0_i32_0 = arith.constant 0 : i32
    %c0_i32_1 = arith.constant 0 : i32
    return %arg1, %c0_i32, %c0_i32_0 : i32, i32, i32
  }
  func.func @transform_19(%arg0: i32, %arg1: i32, %arg2: memref<16xi32, #tpu.memory_space<smem>>) -> (i32, i32, i32) {
    %c0_i32 = arith.constant 0 : i32
    %c0_i32_0 = arith.constant 0 : i32
    %c0_i32_1 = arith.constant 0 : i32
    return %arg1, %c0_i32, %c0_i32_0 : i32, i32, i32
  }
  func.func @transform_20(%arg0: i32, %arg1: i32, %arg2: memref<16xi32, #tpu.memory_space<smem>>) -> (i32, i32, i32) {
    %c0_i32 = arith.constant 0 : i32
    %c0_i32_0 = arith.constant 0 : i32
    %c0_i32_1 = arith.constant 0 : i32
    return %arg1, %c0_i32, %c0_i32_0 : i32, i32, i32
  }
  func.func @transform_21(%arg0: i32, %arg1: i32, %arg2: memref<16xi32, #tpu.memory_space<smem>>) -> (i32, i32, i32) {
    %c0_i32 = arith.constant 0 : i32
    %c0_i32_0 = arith.constant 0 : i32
    %c0_i32_1 = arith.constant 0 : i32
    return %arg1, %c0_i32, %c0_i32_0 : i32, i32, i32
  }
  func.func @transform_22(%arg0: i32, %arg1: i32, %arg2: memref<16xi32, #tpu.memory_space<smem>>) -> (i32, i32, i32) {
    %c0_i32 = arith.constant 0 : i32
    %c0_i32_0 = arith.constant 0 : i32
    %c0_i32_1 = arith.constant 0 : i32
    return %arg1, %c0_i32, %c0_i32_0 : i32, i32, i32
  }
  func.func @transform_23(%arg0: i32, %arg1: i32, %arg2: memref<16xi32, #tpu.memory_space<smem>>) -> (i32, i32, i32) {
    %c0_i32 = arith.constant 0 : i32
    %c0_i32_0 = arith.constant 0 : i32
    %c0_i32_1 = arith.constant 0 : i32
    return %arg1, %c0_i32, %c0_i32_0 : i32, i32, i32
  }
  func.func @transform_24(%arg0: i32, %arg1: i32, %arg2: memref<16xi32, #tpu.memory_space<smem>>) -> (i32, i32, i32) {
    %c0_i32 = arith.constant 0 : i32
    %c0_i32_0 = arith.constant 0 : i32
    %c0_i32_1 = arith.constant 0 : i32
    return %arg1, %c0_i32, %c0_i32_0 : i32, i32, i32
  }
  func.func @transform_25(%arg0: i32, %arg1: i32, %arg2: memref<16xi32, #tpu.memory_space<smem>>) -> (i32, i32, i32) {
    %c0_i32 = arith.constant 0 : i32
    %c0_i32_0 = arith.constant 0 : i32
    %c0_i32_1 = arith.constant 0 : i32
    return %arg1, %c0_i32, %c0_i32_0 : i32, i32, i32
  }
  func.func @transform_26(%arg0: i32, %arg1: i32, %arg2: memref<16xi32, #tpu.memory_space<smem>>) -> (i32, i32, i32) {
    %c0_i32 = arith.constant 0 : i32
    %c0_i32_0 = arith.constant 0 : i32
    %c0_i32_1 = arith.constant 0 : i32
    return %arg1, %c0_i32, %c0_i32_0 : i32, i32, i32
  }
  func.func @transform_27(%arg0: i32, %arg1: i32, %arg2: memref<16xi32, #tpu.memory_space<smem>>) -> (i32, i32) {
    %c0_i32 = arith.constant 0 : i32
    %c0_i32_0 = arith.constant 0 : i32
    return %arg0, %c0_i32 : i32, i32
  }
}

</mosaic_0001>

<bundles_post_ra>
// kernel: tpu_custom_call.1
= control target key start
LH: loop header
LB: loop body
LE: loop exit
PB: predicated region body
PF: predicated region fallthrough
CT: control target
= control target key end

     0   :  { %s3931_s30 = smov [#allocation7]   ;;  %s4594_s0 = inlined_call_operand.hbm [shape: s32[16], index: 0, kind: input, shape index: {}]   ;;  %s4595_s1 = inlined_call_operand.vmem [shape: f32[64,32], index: 1, kind: input, shape index: {}]   ;;  %s4596_s2 = inlined_call_operand.vmem [shape: f32[16,48], index: 2, kind: input, shape index: {}]   ;;  %s4597_s3 = inlined_call_operand.vmem [shape: f32[48,32], index: 3, kind: input, shape index: {}]   ;;  %s4598_s4 = inlined_call_operand.hbm [shape: f32[1,32], index: 4, kind: input, shape index: {}]   ;;  %s4599_s5 = inlined_call_operand.hbm [shape: f32[16,24], index: 5, kind: input, shape index: {}]   ;;  %s4600_s6 = inlined_call_operand.hbm [shape: f32[24,32], index: 6, kind: input, shape index: {}]   ;;  %s4601_s7 = inlined_call_operand.hbm [shape: f32[1,32], index: 7, kind: input, shape index: {}]   ;;  %s4602_s8 = inlined_call_operand.hbm [shape: f32[32,32], index: 8, kind: input, shape index: {}]   ;;  %s4603_s9 = inlined_call_operand.hbm [shape: f32[32,32], index: 9, kind: input, shape index: {}]   ;;  %s4604_s10 = inlined_call_operand.hbm [shape: f32[32,32], index: 10, kind: input, shape index: {}]   ;;  %s4605_s11 = inlined_call_operand.hbm [shape: f32[1,32], index: 11, kind: input, shape index: {}]   ;;  %s4606_s12 = inlined_call_operand.vmem [shape: f32[2,32,32], index: 12, kind: input, shape index: {}]   ;;  %s4607_s13 = inlined_call_operand.vmem [shape: f32[2,1,32], index: 13, kind: input, shape index: {}]   ;;  %s4608_s14 = inlined_call_operand.vmem [shape: f32[2,32,32], index: 14, kind: input, shape index: {}]   ;;  %s4609_s15 = inlined_call_operand.vmem [shape: f32[2,1,32], index: 15, kind: input, shape index: {}]   ;;  %s4610_s16 = inlined_call_operand.vmem [shape: f32[2,32,32], index: 16, kind: input, shape index: {}]   ;;  %s4611_s17 = inlined_call_operand.vmem [shape: f32[2,1,32], index: 17, kind: input, shape index: {}]   ;;  %s4612_s18 = inlined_call_operand.vmem [shape: f32[2,32,32], index: 18, kind: input, shape index: {}]   ;;  %s4613_s19 = inlined_call_operand.vmem [shape: f32[2,1,32], index: 19, kind: input, shape index: {}]   ;;  %s4614_s20 = inlined_call_operand.vmem [shape: f32[2,1,32], index: 20, kind: input, shape index: {}]   ;;  %s4615_s21 = inlined_call_operand.vmem [shape: f32[2,1,32], index: 21, kind: input, shape index: {}]   ;;  %s4616_s22 = inlined_call_operand.hbm [shape: f32[2,32,64], index: 22, kind: input, shape index: {}]   ;;  %s4617_s23 = inlined_call_operand.vmem [shape: f32[2,1,64], index: 23, kind: input, shape index: {}]   ;;  %s4618_s24 = inlined_call_operand.vmem [shape: f32[2,64,32], index: 24, kind: input, shape index: {}]   ;;  %s4619_s25 = inlined_call_operand.vmem [shape: f32[2,1,32], index: 25, kind: input, shape index: {}]   ;;  %s4620_s26 = inlined_call_operand.vmem [shape: f32[2,1,32], index: 26, kind: input, shape index: {}]   ;;  %s4621_s27 = inlined_call_operand.vmem [shape: f32[2,1,32], index: 27, kind: input, shape index: {}]   ;;  %s4622_s28 = inlined_call_operand.hbm [shape: f32[16,32], index: 28, kind: output, shape index: {}]  }
   0x1   :  { %4632 = sst [smem:[#allocation71_spill]] %s4594_s0 }
   0x2   :  { %4633 = sst [smem:[#allocation72_spill]] %s4595_s1 }
   0x3   :  { %4634 = sst [smem:[#allocation73_spill]] %s4596_s2 }
   0x4   :  { %4635 = sst [smem:[#allocation74_spill]] %s4597_s3 }
   0x5   :  { %4636 = sst [smem:[#allocation75_spill]] %s4598_s4 }
   0x6   :  { %4637 = sst [smem:[#allocation76_spill]] %s4599_s5 }
   0x7   :  { %4638 = sst [smem:[#allocation77_spill]] %s4600_s6 }
   0x8   :  { %4639 = sst [smem:[#allocation78_spill]] %s4601_s7 }
   0x9   :  { %4640 = sst [smem:[#allocation79_spill]] %s4602_s8 }
   0xa   :  { %4641 = sst [smem:[#allocation80_spill]] %s4603_s9 }
   0xb   :  { %4642 = sst [smem:[#allocation81_spill]] %s4604_s10 }
   0xc   :  { %4643 = sst [smem:[#allocation82_spill]] %s4605_s11 }
   0xd   :  { %4644 = sst [smem:[#allocation83_spill]] %s4606_s12 }
   0xe   :  { %4645 = sst [smem:[#allocation84_spill]] %s4608_s14 }
   0xf   :  { %4646 = sst [smem:[#allocation85_spill]] %s4610_s16 }
  0x10   :  { %4647 = sst [smem:[#allocation86_spill]] %s4611_s17 }
  0x11   :  { %4648 = sst [smem:[#allocation87_spill]] %s4612_s18 }
  0x12   :  { %4649 = sst [smem:[#allocation88_spill]] %s4613_s19 }
  0x13   :  { %4650 = sst [smem:[#allocation89_spill]] %s4614_s20 }
  0x14   :  { %4651 = sst [smem:[#allocation90_spill]] %s4615_s21 }
  0x15   :  { %4652 = sst [smem:[#allocation91_spill]] %s4616_s22 }
  0x16   :  { %4653 = sst [smem:[#allocation92_spill]] %s4617_s23 }
  0x17   :  { %4654 = sst [smem:[#allocation93_spill]] %s4618_s24 }
  0x18   :  { %4655 = sst [smem:[#allocation94_spill]] %s4619_s25 }
  0x19   :  { %4656 = sst [smem:[#allocation95_spill]] %s4620_s26 }
  0x1a   :  { %4657 = sst [smem:[#allocation96_spill]] %s4621_s27 }
  0x1b   :  { %4658 = sst [smem:[#allocation97_spill]] %s4622_s28 }
  0x1c   :  { %s4659_s9 = sld [smem:[#allocation71_spill]] }
  0x22   :  { %s34_s21 = sshll.u32 %s4659_s9, 4  ;;  %s35_s21 = int_to_ptr.hbm [resolvable:$true] %s34_s21 }
  0x23   :  { %37 = dma.hbm_to_smem %s35_s21, 16, %s3931_s30, [#allocation6] }
  0x24   :  { %3845 = dma.done.wait [#allocation6], 16 }
  0x25   :  { %3846 = vsyncadd [#allocation6], 4294967280 }
  0x26   :  { %40 = sfence }
  0x27   :  { %41 = vsyncpa [#allocation9], 0 }
  0x28   :  { %42 = vsyncpa [#allocation12], 0 }
  0x29   :  { %43 = vsyncpa [#allocation15], 0 }
  0x2a   :  { %44 = vsyncpa [#allocation18], 0 }
  0x2b   :  { %45 = vsyncpa [#allocation21], 0 }
  0x2c   :  { %46 = vsyncpa [#allocation10], 0  ;;  %s4096_s3 = smov 0   ;;  %s4098_s6 = smov 0  }
  0x2d   :  { %s4100_s10 = smov 0   ;;  %s4102_s0 = smov 0  }
  0x2e   :  { %s4104_s11 = smov 0   ;;  %s4106_s21 = smov 0  }
  0x2f LB: > { %4660 = sst [smem:[#allocation64_spill]] %s3913_s6  ;;  %s4127_s29 = sadd.s32 4294967295, %s3929_s21   ;;  %s3929_s21 = sphi %s4106_s21, %s52_s21   ;;  %s3925_s11 = sphi %s4104_s11, %s4716_s11   ;;  %s3921_s0 = sphi %s4102_s0, %s4715_s0   ;;  %s3917_s10 = sphi %s4100_s10, %s4714_s10   ;;  %s3913_s6 = sphi %s4098_s6, %s4713_s6   ;;  %s3909_s3 = sphi %s4096_s3, %s4712_s3  }
  0x30   : > { %4661 = sst [smem:[#allocation65_spill]] %s3917_s10  ;;  %p3207_p0 = scmp.ge.s32.totalorder %s3929_s21, 1 }
  0x31   : > { %4662 = sst [smem:[#allocation66_spill]] %s3925_s11  ;;  %p565_p1 = scmp.eq.s32.totalorder %s4127_s29, 0 }
  0x32   : > { %4663 = sst [smem:[#allocation67_spill]] %s3929_s21  ;;  %p731_p2 = scmp.lt.s32.totalorder %s3929_s21, 3 }
  0x33   : > { %4664 = sst [smem:[#allocation68_spill]] %s4127_s29  ;;  %s3932_s8 = smov [#allocation8]  }
  0x34   : > { %s4665_s12 = sld [smem:[#allocation75_spill]]  ;;  %p4135_p3 = pnand %p3207_p0, %p731_p2 }
  0x35   : > { %s757_s5 = sshll.u32 %s3932_s8, 4  ;;  %s4667_s28 = sld [smem:[#allocation76_spill]]  ;;  %s758_s5 = int_to_ptr.vmem [resolvable:$true] %s757_s5 }
  0x36   : > { %p3359_p4 = pneg %p4135_p3  ;;  %s3933_s2 = smov [#allocation11]  }
  0x37   : > { %s771_s7 = sshll.u32 %s3933_s2, 4  ;;  %s3935_s8 = smov 8   ;;  %s772_s7 = int_to_ptr.vmem [resolvable:$true] %s771_s7 }
  0x38   : > { %p4146_p5 = pnand %p3359_p4, %p565_p1  ;;  %s4669_s30 = sld [smem:[#allocation78_spill]] }
  0x39   : > { %s3936_s25 = smov [#allocation14]   ;;  %s3937_s19 = smov [#allocation17]  }
  0x3a   : > { %s755_s1 = sshll.u32 %s4665_s12, 4  ;;  %s3934_s12 = smov 128   ;;  %s756_s1 = int_to_ptr.hbm [resolvable:$true] %s755_s1 }
  0x3b   : > { %s769_s27 = sshll.u32 %s4667_s28, 4  ;;  %s800_s23 = sshll.u32 %s3936_s25, 4  ;;  %s770_s27 = int_to_ptr.hbm [resolvable:$true] %s769_s27  ;;  %s801_s23 = int_to_ptr.vmem [resolvable:$true] %s800_s23 }
  0x3c   : > { %3362 = dma.hbm_to_vmem [thread:$0]  (!%p4146_p5), %s756_s1, 16, %s758_s5, [#allocation9]  }
  0x3d   : > { %3365 = dma.hbm_to_vmem [thread:$0]  (!%p4146_p5), %s770_s27, 256, %s772_s7, [#allocation12], %s3934_s12, %s3934_s12, %s3935_s8  }
  0x3e   : > { %s798_s24 = sshll.u32 %s4669_s30, 4  ;;  %s4670_s5 = sld [smem:[#allocation80_spill]]  ;;  %s799_s24 = int_to_ptr.hbm [resolvable:$true] %s798_s24 }
  0x3f   : > { %3371 = dma.hbm_to_vmem [thread:$0]  (!%p4146_p5), %s799_s24, 16, %s801_s23, [#allocation15]  }
  0x40   : > { %s825_s18 = sshll.u32 %s3937_s19, 4  ;;  %s4671_s7 = sld [smem:[#allocation77_spill]]  ;;  %s826_s18 = int_to_ptr.vmem [resolvable:$true] %s825_s18 }
  0x41   : > { %s4672_s30 = sld [smem:[#allocation79_spill]]  ;;  %s3938_s23 = smov [#allocation13]  }
  0x42   : > { %s785_s24 = sshll.u32 %s3938_s23, 4  ;;  %s3939_s17 = smov [#allocation16]   ;;  %s786_s24 = int_to_ptr.vmem [resolvable:$true] %s785_s24 }
  0x43   : > { %s811_s19 = sshll.u32 %s3939_s17, 4  ;;  %s3940_s9 = smov [#allocation19]   ;;  %s812_s19 = int_to_ptr.vmem [resolvable:$true] %s811_s19 }
  0x44   : > { %s823_s20 = sshll.u32 %s4670_s5, 4  ;;  %s3941_s23 = smov [#allocation20]   ;;  %s824_s20 = int_to_ptr.hbm [resolvable:$true] %s823_s20 }
  0x45   : > { %3377 = dma.hbm_to_vmem [thread:$0]  (!%p4146_p5), %s824_s20, 512, %s826_s18, [#allocation18], %s3934_s12, %s3934_s12, %s3935_s8  }
  0x46   : > { %s783_s28 = sshll.u32 %s4671_s7, 4  ;;  %s4673_s20 = sld [smem:[#allocation81_spill]]  ;;  %s784_s28 = int_to_ptr.hbm [resolvable:$true] %s783_s28 }
  0x47   : > { %s809_s2 = sshll.u32 %s4672_s30, 4  ;;  %s839_s30 = sshll.u32 %s3940_s9, 4  ;;  %s810_s2 = int_to_ptr.hbm [resolvable:$true] %s809_s2  ;;  %s840_s30 = int_to_ptr.vmem [resolvable:$true] %s839_s30 }
  0x48   : > { %3368 = dma.hbm_to_vmem [thread:$0]  (!%p4146_p5), %s784_s28, 384, %s786_s24, [#allocation12], %s3934_s12, %s3934_s12, %s3935_s8  }
  0x49   : > { %3374 = dma.hbm_to_vmem [thread:$0]  (!%p4146_p5), %s810_s2, 512, %s812_s19, [#allocation15], %s3934_s12, %s3934_s12, %s3935_s8  }
  0x4a   : > { %s4674_s28 = sld [smem:[#allocation82_spill]]  ;;  %s854_s2 = sshll.u32 %s3941_s23, 4  ;;  %s855_s2 = int_to_ptr.vmem [resolvable:$true] %s854_s2 }
  0x4b   : > { %s61_s24 = sadd.s32 1, %s3925_s11  ;;  %p558_p7 = scmp.ne.s32.totalorder %s3917_s10, %s3913_s6 }
  0x4c   : > { %s837_s5 = sshll.u32 %s4673_s20, 4  ;;  %p62_p6 = scmp.ge.s32.totalorder %s61_s24, 2  ;;  %s838_s5 = int_to_ptr.hbm [resolvable:$true] %s837_s5 }
  0x4d   : > { %3380 = dma.hbm_to_vmem [thread:$0]  (!%p4146_p5), %s838_s5, 512, %s840_s30, [#allocation18], %s3934_s12, %s3934_s12, %s3935_s8  }
  0x4e   : > { %p559_p8 = scmp.eq.s32.totalorder %s3929_s21, 0  ;;  %p564_p9 = scmp.ne.s32.totalorder %s3913_s6, %s3909_s3 }
  0x4f   : > { %s4718_s24 = smov (%p62_p6, %s61_s24), 0  ;;  %s551_s17 = sadd.s32 1, %s3917_s10 }
  0x50   : > { %s852_s25 = sshll.u32 %s4674_s28, 4  ;;  %4675 = sst [smem:[#allocation69_spill]] %s4718_s24  ;;  %s853_s25 = int_to_ptr.hbm [resolvable:$true] %s852_s25 }
  0x51   : > { %3383 = dma.hbm_to_vmem [thread:$0]  (!%p4146_p5), %s853_s25, 16, %s855_s2, [#allocation21]  }
  0x52   : > { %p4210_p10 = por %p565_p1, %p564_p9  ;;  %s548_s1 = ssub.s32 %s3925_s11, %s4718_s24 }
  0x53   : > { %p4216_p11 = por %p559_p8, %p558_p7  ;;  %p549_p12 = scmp.eq.s32.totalorder %s548_s1, 0 }
  0x54   : > { %p3396_p13 = scmp.lt.s32.totalorder %s3929_s21, 2  ;;  %s933_s18 = sand.u32 1, %s3929_s21  }
  0x55   : > { %s935_s20 = sand.u32 1, %s3917_s10   ;;  %s3312_s27 = sshll.u32 %s3925_s11, 5 }
  0x56   : > { %s4224_s3 = scalar_select %p549_p12, %s3917_s10, %s551_s17  }
  0x57   : > { %s3218_s5 = sshll.u32 %s935_s20, 5  ;;  %s4679_s22 = sld [smem:[#allocation91_spill]] }
  0x58   : > { %4678 = sst [smem:[#allocation70_spill]] %s4224_s3  ;;  %s937_s30 = scalar_lea.vmem [#allocation22], %s3218_s5 }
  0x59   : > { %s945_s23 = sshll.u32 %s937_s30, 4  ;;  %p3385_p0 = pnand %p3396_p13, %p4216_p11  ;;  %s946_s23 = int_to_ptr.vmem [resolvable:$true] %s945_s23 }
  0x5a   : > { %s934_s2 = scalar_lea.sflag [#allocation9], %s933_s18 }
  0x5b   : > { %989 = sbr.rel (%p4135_p3) target bundleno = 2732 (0xaac), region = 124 }
  0x5d   : > { %s942_s25 = scalar_lea.hbm %s4679_s22, %s3312_s27 }
  0x5e   : > { %s943_s9 = sshll.u32 %s942_s25, 4  ;;  %s944_s9 = int_to_ptr.hbm [resolvable:$true] %s943_s9 }
  0x5f   : > { %3387 = dma.hbm_to_vmem [thread:$0]  (!%p3385_p0), %s944_s9, 512, %s946_s23, %s934_s2, %s3934_s12, %s3934_s12, %s3935_s8  }
  0x60   : > { %3848 = dma.done.wait (%p565_p1), [#allocation9], 16  }
  0x61   : > { %3850 = vsyncadd (%p565_p1), [#allocation9], 4294967280 }
  0x62   : > { %3852 = dma.done.wait (%p565_p1), [#allocation12], 640  }
  0x63   : > { %3854 = vsyncadd (%p565_p1), [#allocation12], 4294966656 }
  0x64   : > { %3856 = dma.done.wait (%p565_p1), [#allocation15], 528  }
  0x65   : > { %3858 = vsyncadd (%p565_p1), [#allocation15], 4294966768 }
  0x66   : > { %3860 = dma.done.wait (%p565_p1), [#allocation18], 1024  }
  0x67   : > { %3862 = vsyncadd (%p565_p1), [#allocation18], 4294966272 }
  0x68   : > { %3864 = dma.done.wait (%p565_p1), [#allocation21], 16  }
  0x69   : > { %3866 = vsyncadd (%p565_p1), [#allocation21], 4294967280  ;;  %s1031_s4 = sand.u32 1, %s4127_s29   ;;  %s1033_s12 = sand.u32 1, %s3913_s6  }
  0x6a   : > { %s3230_s8 = sshll.u32 %s1033_s12, 5  ;;  %s1032_s17 = scalar_lea.sflag [#allocation9], %s1031_s4 }
  0x6b   : > { %s4259_s1 = scalar_lea.vmem [#allocation22], %s3230_s8 }
  0x6c   : > { %3868 = dma.done.wait (%p4210_p10), %s1032_s17, 512  }
  0x6d   : > { %3870 = vsyncadd (%p4210_p10), %s1032_s17, 4294966784  ;;  %p1167_p2 = scmp.lt.s32.totalorder %s3921_s0, 1  ;;  %s4680_s28 = sld [smem:[#allocation83_spill]] }
  0x6e   : > { %s4681_s14 = sld [smem:[#allocation84_spill]]  ;;  %p3241_p1 = scmp.ne.s32.totalorder %s3921_s0, 0 }
  0x6f   : > { %s4267_s26 = scalar_select %p1167_p2, %s3921_s0, 1 }
  0x70   : > { %s4682_s16 = sld [smem:[#allocation85_spill]] }
  0x71   : > { %s3313_s18 = sshll.u32 %s4267_s26, 5  ;;  %s4684_s24 = sld [smem:[#allocation87_spill]] }
  0x72   : > { %s4688_s22 = sld [smem:[#allocation92_spill]]  ;;  %s3317_s27 = sshll.u32 %s4267_s26, 6 }
  0x73   : > { %s4277_s25 = scalar_lea.vmem %s4680_s28, %s3313_s18  ;;  %s4691_s4 = sld [smem:[#allocation95_spill]] }
  0x74   : > { %s4282_s23 = scalar_lea.vmem %s4681_s14, %s3313_s18  ;;  %s4685_s14 = sld [smem:[#allocation88_spill]] }
  0x75   : > { %s4692_s17 = sld [smem:[#allocation96_spill]] }
  0x76   : > { %s4291_s20 = scalar_lea.vmem %s4682_s16, %s3313_s18  ;;  %s1228_s21 = sld [smem:[#allocation7]] (!%p3241_p1) }
  0x77   : > { %s4300_s11 = scalar_lea.vmem %s4684_s24, %s3313_s18  ;;  %s4689_s18 = sld [smem:[#allocation94_spill]] }
  0x78   : > { %s1207_s19 = scalar_lea.vmem %s4688_s22, %s4267_s26  ;;  %s4693_s7 = sld [smem:[#allocation72_spill]] (!%p3241_p1) }
  0x79   : > { %s1218_s10 = scalar_lea.vmem %s4691_s4, %s4267_s26 }
  0x7a   : > { %s1198_s3 = scalar_lea.vmem %s4685_s14, %s4267_s26  ;;  %s4690_s14 = sld [smem:[#allocation93_spill]] }
  0x7b   : > { %s1221_s6 = scalar_lea.vmem %s4692_s17, %s4267_s26 }
  0x7c   : > { %1226 = sbr.rel (%p3241_p1) target bundleno = 591 (0x24f), region = 164 }
  0x7d   : > { %s1215_s28 = scalar_lea.vmem %s4689_s18, %s4267_s26 }
  0x7e   : > { %s1229_s24 = scalar_lea.vmem (!%p3241_p1), %s4693_s7, %s1228_s21 }
  0x80   : > { %s4326_s30 = scalar_lea.vmem %s4690_s14, %s3317_s27 }
  0x81   : > { %v1244_v0 = vld [vmem:[%s1229_s24] sm:$0x1] }
  0x82   : > { %1245 = vst [vmem:[#allocation3] sm:$0x1] %v1244_v0 }
  0x83   : > { %1263 = vsyncadd [#allocation5], 16  ;;  %s3242_s29 = sld [smem:[#allocation7 + $0x1]] }
  0x89   : > { %s1266_s9 = scalar_lea.vmem %s4693_s7, %s3242_s29 }
  0x8a   : > { %v1283_v1 = vld [vmem:[%s1266_s9] sm:$0x1] }
  0x8b   : > { %1284 = vst [vmem:[#allocation3 + $0x1] sm:$0x1] %v1283_v1 }
  0x8c   : > { %1302 = vsyncadd [#allocation5 + $0x1], 16  ;;  %s3243_s14 = sld [smem:[#allocation7 + $0x2]] }
  0x92   : > { %s1305_s4 = scalar_lea.vmem %s4693_s7, %s3243_s14 }
  0x93   : > { %v1322_v2 = vld [vmem:[%s1305_s4] sm:$0x1] }
  0x94   : > { %1323 = vst [vmem:[#allocation3 + $0x2] sm:$0x1] %v1322_v2 }
  0x95   : > { %1341 = vsyncadd [#allocation5 + $0x2], 16  ;;  %s3244_s8 = sld [smem:[#allocation7 + $0x3]] }
  0x9b   : > { %s1344_s21 = scalar_lea.vmem %s4693_s7, %s3244_s8 }
  0x9c   : > { %v1361_v3 = vld [vmem:[%s1344_s21] sm:$0x1] }
  0x9d   : > { %1362 = vst [vmem:[#allocation3 + $0x3] sm:$0x1] %v1361_v3 }
  0x9e   : > { %1380 = vsyncadd [#allocation5 + $0x3], 16  ;;  %s3245_s5 = sld [smem:[#allocation7 + $0x4]] }
  0xa4   : > { %s1383_s29 = scalar_lea.vmem %s4693_s7, %s3245_s5 }
  0xa5   : > { %v1400_v4 = vld [vmem:[%s1383_s29] sm:$0x1] }
  0xa6   : > { %1401 = vst [vmem:[#allocation3 + $0x4] sm:$0x1] %v1400_v4 }
  0xa7   : > { %1419 = vsyncadd [#allocation5 + $0x4], 16  ;;  %s3246_s27 = sld [smem:[#allocation7 + $0x5]] }
  0xad   : > { %s1422_s14 = scalar_lea.vmem %s4693_s7, %s3246_s27 }
  0xae   : > { %v1439_v5 = vld [vmem:[%s1422_s14] sm:$0x1] }
  0xaf   : > { %1440 = vst [vmem:[#allocation3 + $0x5] sm:$0x1] %v1439_v5 }
  0xb0   : > { %1458 = vsyncadd [#allocation5 + $0x5], 16  ;;  %s3247_s2 = sld [smem:[#allocation7 + $0x6]] }
  0xb6   : > { %s1461_s8 = scalar_lea.vmem %s4693_s7, %s3247_s2 }
  0xb7   : > { %v1478_v6 = vld [vmem:[%s1461_s8] sm:$0x1] }
  0xb8   : > { %1479 = vst [vmem:[#allocation3 + $0x6] sm:$0x1] %v1478_v6 }
  0xb9   : > { %1497 = vsyncadd [#allocation5 + $0x6], 16  ;;  %s3248_s16 = sld [smem:[#allocation7 + $0x7]] }
  0xbf   : > { %s1500_s5 = scalar_lea.vmem %s4693_s7, %s3248_s16 }
  0xc0   : > { %v1517_v7 = vld [vmem:[%s1500_s5] sm:$0x1] }
  0xc1   : > { %1518 = vst [vmem:[#allocation3 + $0x7] sm:$0x1] %v1517_v7 }
  0xc2   : > { %1536 = vsyncadd [#allocation5 + $0x7], 16  ;;  %s3249_s22 = sld [smem:[#allocation7 + $0x8]] }
  0xc8   : > { %s1539_s27 = scalar_lea.vmem %s4693_s7, %s3249_s22 }
  0xc9   : > { %v1556_v8 = vld [vmem:[%s1539_s27] sm:$0x1] }
  0xca   : > { %1557 = vst [vmem:[#allocation3 + $0x8] sm:$0x1] %v1556_v8 }
  0xcb   : > { %1575 = vsyncadd [#allocation5 + $0x8], 16  ;;  %s3250_s18 = sld [smem:[#allocation7 + $0x9]] }
  0xd1   : > { %s1578_s2 = scalar_lea.vmem %s4693_s7, %s3250_s18 }
  0xd2   : > { %v1595_v9 = vld [vmem:[%s1578_s2] sm:$0x1] }
  0xd3   : > { %1596 = vst [vmem:[#allocation3 + $0x9] sm:$0x1] %v1595_v9 }
  0xd4   : > { %1614 = vsyncadd [#allocation5 + $0x9], 16  ;;  %s3251_s12 = sld [smem:[#allocation7 + $0xa]] }
  0xda   : > { %s1617_s16 = scalar_lea.vmem %s4693_s7, %s3251_s12 }
  0xdb   : > { %v1634_v10 = vld [vmem:[%s1617_s16] sm:$0x1] }
  0xdc   : > { %1635 = vst [vmem:[#allocation3 + $0xa] sm:$0x1] %v1634_v10 }
  0xdd   : > { %1653 = vsyncadd [#allocation5 + $0xa], 16  ;;  %s3252_s17 = sld [smem:[#allocation7 + $0xb]] }
  0xe3   : > { %s1656_s22 = scalar_lea.vmem %s4693_s7, %s3252_s17 }
  0xe4   : > { %v1673_v11 = vld [vmem:[%s1656_s22] sm:$0x1] }
  0xe5   : > { %1674 = vst [vmem:[#allocation3 + $0xb] sm:$0x1] %v1673_v11 }
  0xe6   : > { %1692 = vsyncadd [#allocation5 + $0xb], 16  ;;  %s3253_s24 = sld [smem:[#allocation7 + $0xc]] }
  0xec   : > { %s1695_s18 = scalar_lea.vmem %s4693_s7, %s3253_s24 }
  0xed   : > { %v1712_v12 = vld [vmem:[%s1695_s18] sm:$0x1] }
  0xee   : > { %1713 = vst [vmem:[#allocation3 + $0xc] sm:$0x1] %v1712_v12 }
  0xef   : > { %1731 = vsyncadd [#allocation5 + $0xc], 16  ;;  %s3254_s9 = sld [smem:[#allocation7 + $0xd]] }
  0xf5   : > { %s1734_s12 = scalar_lea.vmem %s4693_s7, %s3254_s9 }
  0xf6   : > { %v1751_v13 = vld [vmem:[%s1734_s12] sm:$0x1] }
  0xf7   : > { %1752 = vst [vmem:[#allocation3 + $0xd] sm:$0x1] %v1751_v13 }
  0xf8   : > { %1770 = vsyncadd [#allocation5 + $0xd], 16  ;;  %s3255_s4 = sld [smem:[#allocation7 + $0xe]] }
  0xfe   : > { %s1773_s17 = scalar_lea.vmem %s4693_s7, %s3255_s4 }
  0xff   : > { %v1790_v14 = vld [vmem:[%s1773_s17] sm:$0x1] }
 0x100   : > { %1791 = vst [vmem:[#allocation3 + $0xe] sm:$0x1] %v1790_v14 }
 0x101   : > { %1809 = vsyncadd [#allocation5 + $0xe], 16  ;;  %s3256_s21 = sld [smem:[#allocation7 + $0xf]] }
 0x107   : > { %s1812_s24 = scalar_lea.vmem %s4693_s7, %s3256_s21 }
 0x108   : > { %v1829_v15 = vld [vmem:[%s1812_s24] sm:$0x1] }
 0x109   : > { %1830 = vst [vmem:[#allocation3 + $0xf] sm:$0x1] %v1829_v15 }
 0x10a   : > { %1848 = vsyncadd [#allocation5 + $0xf], 16 }
 0x10b   : > { %3871 = dma.done.wait [#allocation5], 16 }
 0x10c   : > { %3872 = vsyncadd [#allocation5], 4294967280 }
 0x10d   : > { %3873 = dma.done.wait [#allocation5 + $0x1], 16 }
 0x10e   : > { %3874 = vsyncadd [#allocation5 + $0x1], 4294967280 }
 0x10f   : > { %3875 = dma.done.wait [#allocation5 + $0x2], 16 }
 0x110   : > { %3876 = vsyncadd [#allocation5 + $0x2], 4294967280 }
 0x111   : > { %3877 = dma.done.wait [#allocation5 + $0x3], 16 }
 0x112   : > { %3878 = vsyncadd [#allocation5 + $0x3], 4294967280 }
 0x113   : > { %3879 = dma.done.wait [#allocation5 + $0x4], 16 }
 0x114   : > { %3880 = vsyncadd [#allocation5 + $0x4], 4294967280 }
 0x115   : > { %3881 = dma.done.wait [#allocation5 + $0x5], 16 }
 0x116   : > { %3882 = vsyncadd [#allocation5 + $0x5], 4294967280 }
 0x117   : > { %3883 = dma.done.wait [#allocation5 + $0x6], 16 }
 0x118   : > { %3884 = vsyncadd [#allocation5 + $0x6], 4294967280 }
 0x119   : > { %3885 = dma.done.wait [#allocation5 + $0x7], 16 }
 0x11a   : > { %3886 = vsyncadd [#allocation5 + $0x7], 4294967280 }
 0x11b   : > { %3887 = dma.done.wait [#allocation5 + $0x8], 16 }
 0x11c   : > { %3888 = vsyncadd [#allocation5 + $0x8], 4294967280 }
 0x11d   : > { %3889 = dma.done.wait [#allocation5 + $0x9], 16 }
 0x11e   : > { %3890 = vsyncadd [#allocation5 + $0x9], 4294967280 }
 0x11f   : > { %3891 = dma.done.wait [#allocation5 + $0xa], 16 }
 0x120   : > { %3892 = vsyncadd [#allocation5 + $0xa], 4294967280 }
 0x121   : > { %3893 = dma.done.wait [#allocation5 + $0xb], 16 }
 0x122   : > { %3894 = vsyncadd [#allocation5 + $0xb], 4294967280 }
 0x123   : > { %3895 = dma.done.wait [#allocation5 + $0xc], 16 }
 0x124   : > { %3896 = vsyncadd [#allocation5 + $0xc], 4294967280 }
 0x125   : > { %3897 = dma.done.wait [#allocation5 + $0xd], 16 }
 0x126   : > { %3898 = vsyncadd [#allocation5 + $0xd], 4294967280 }
 0x127   : > { %3899 = dma.done.wait [#allocation5 + $0xe], 16 }
 0x128   : > { %3900 = vsyncadd [#allocation5 + $0xe], 4294967280 }
 0x129   : > { %3901 = dma.done.wait [#allocation5 + $0xf], 16 }
 0x12a   : > { %3902 = vsyncadd [#allocation5 + $0xf], 4294967280  ;;  %s4694_s18 = sld [smem:[#allocation74_spill]]  ;;  %v1928_v19 = vld [vmem:[#allocation13 + $0x10] sm:$0xff]  ;;  %v1927_v20 = vld [vmem:[#allocation13 + $0x8] sm:$0xff]  ;;  %vm1933_vm0 = vcmask 195584  }
 0x12b   : > { %1953 = vmatpush.msra.mxu1 %v1928_v19  ;;  %3318 = vmatpush.msra.mxu2 %v1928_v19  ;;  %v1926_v22 = vld [vmem:[#allocation13] sm:$0xff]  ;;  %v1968_v23 = vld [vmem:[#allocation16 + $0x18] sm:$0xff]  ;;  %v1967_v28 = vld [vmem:[#allocation16 + $0x10] sm:$0xff]  ;;  %s4695_s29 = sld [smem:[#allocation73_spill]]  ;;  %vm1894_vm1 = vcmask 392192   ;;  %vm1973_vm2 = vcmask 261120  }
 0x12c   : > { %v1924_v25 = vld [vmem:[#allocation11] sm:$0xff]  ;;  %v1925_v26 = vld [vmem:[#allocation11 + $0x8] sm:$0xff]  ;;  %2021 = vmatpush.msra.mxu3 %v1968_v23  ;;  %v1970_v32 = vld [vmem:[#allocation17 + $0x8] sm:$0xff] }
 0x12d   : > { %1954 = vmatpush.msra.mxu1 %v1927_v20  ;;  %3319 = vmatpush.msra.mxu2 %v1927_v20  ;;  %v1972_v27 = vld [vmem:[#allocation17 + $0x18] sm:$0xff]  ;;  %v1971_v31 = vld [vmem:[#allocation17 + $0x10] sm:$0xff]  ;;  %v1966_v34 = vld [vmem:[#allocation16 + $0x8] sm:$0xff] }
 0x12e   : > { %2022 = vmatpush.msra.mxu3 %v1967_v28  ;;  %v1969_v35 = vld [vmem:[#allocation17] sm:$0xff]  ;;  %v1963_v37 = vld [vmem:[#allocation3] sm:$0xff]  ;;  %v2033_v40 = vld [vmem:[#allocation19 + $0x8] sm:$0xff] }
 0x12f   : > { %1955 = vmatpush.msra.mxu1 %v1926_v22  ;;  %3320 = vmatpush.msra.mxu2 %v1926_v22  ;;  %v1965_v36 = vld [vmem:[#allocation16] sm:$0xff]  ;;  %v2035_v38 = vld [vmem:[#allocation19 + $0x18] sm:$0xff]  ;;  %v2034_v39 = vld [vmem:[#allocation19 + $0x10] sm:$0xff] }
 0x130   : > { %v1889_v16 = vld [vmem:[%s4694_s18 + $0x28] sm:$0xff]  ;;  %v1888_v17 = vld [vmem:[%s4694_s18 + $0x20] sm:$0xff]  ;;  %v1887_v18 = vld [vmem:[%s4694_s18 + $0x18] sm:$0xff]  ;;  %3259 = vmatmul.msk.f32.vlgmr.msra.gmra.mxu1 %vm1933_vm0, %v1924_v25  ;;  %3260 = vmatmul.msk.f32.vlgmr.msra.gmra.mxu2 %vm1933_vm0, %v1925_v26 }
 0x131   : > { %1911 = vmatpush.msra.mxu0 %v1889_v16  ;;  %v1886_v21 = vld [vmem:[%s4694_s18 + $0x10] sm:$0xff]  ;;  %v1885_v24 = vld [vmem:[%s4694_s18 + $0x8] sm:$0xff]  ;;  %v1884_v29 = vld [vmem:[%s4694_s18] sm:$0xff]  ;;  %1992 = vmatpush.msrb.mxu2 %v1972_v27 }
 0x132   : > { %v1882_v30 = vld [vmem:[%s4695_s29] sm:$0xff]  ;;  %v1883_v33 = vld [vmem:[%s4695_s29 + $0x8] sm:$0xff]  ;;  %2023 = vmatpush.msra.mxu3 %v1966_v34  ;;  %2054 = vmatpush.msrb.mxu1 %v2035_v38  ;;  %v1964_v42 = vld [vmem:[#allocation3 + $0x8] sm:$0xff] }
 0x133   : > { %1912 = vmatpush.msra.mxu0 %v1888_v17  ;;  %1993 = vmatpush.msrb.mxu2 %v1971_v31  ;;  %v2032_v41 = vld [vmem:[#allocation19] sm:$0xff]  ;;  %v3473_v43 = vld [vmem:[#allocation14] ss:$0 sm:$0xff]  ;;  %v3472_v45 = vld [vmem:[#allocation8] ss:$0 sm:$0xff] }
 0x134   : > { %2024 = vmatpush.msra.mxu3 %v1965_v36  ;;  %2055 = vmatpush.msrb.mxu1 %v2034_v39  ;;  %v3474_v57 = vld [vmem:[#allocation20] ss:$0 sm:$0xff] }
 0x135   : > { %1913 = vmatpush.msra.mxu0 %v1887_v18  ;;  %1994 = vmatpush.msrb.mxu2 %v1970_v32 }
 0x136   : > { %3263 = vmatmul.msk.f32.vlgmr.msra.gmra.mxu3 %vm1973_vm2, %v1963_v37  ;;  %2056 = vmatpush.msrb.mxu1 %v2033_v40 }
 0x137   : > { %1914 = vmatpush.msra.mxu0 %v1886_v21  ;;  %1995 = vmatpush.msrb.mxu2 %v1969_v35 }
 0x138   : > { %2057 = vmatpush.msrb.mxu1 %v2032_v41 }
 0x139   : > { %1915 = vmatpush.msra.mxu0 %v1885_v24 }
 0x13b   : > { %1916 = vmatpush.msra.mxu0 %v1884_v29 }
 0x13c   : > { %3257 = vmatmul.msk.f32.vlgmr.msra.gmra.mxu0 %vm1894_vm1, %v1882_v30 }
 0x13e   : > { %3264 = vmatmul.msk.f32.gmra.mxu3 %vm1973_vm2, %v1964_v42 }
 0x144   : > { %3258 = vmatmul.msk.f32.gmra.mxu0 %vm1894_vm1, %v1883_v33 }
 0x1ad   : > { %v1957_v44 = vpop.f32.mrf.mxu1 }
 0x1ae   : > { %v1958_v46 = vadd.f32 %v3473_v43, %v1957_v44 }
 0x1b0   : > { %3265 = vmatmul.msk.f32.vlgmr.msrb.gmra.mxu1 %vm1973_vm2, %v1958_v46 }
 0x1b3   : > { %v1960_v49 = vpop.f32.mrf.mxu2 }
 0x1b4   : > { %v1961_v50 = vadd.f32 %v3473_v43, %v1960_v49 }
 0x1b8   : > { %3266 = vmatmul.msk.f32.gmra.mxu1 %vm1973_vm2, %v1961_v50 }
 0x1b9   : > { %v1918_v47 = vpop.f32.mrf.mxu0  ;;  %v2026_v53 = vpop.f32.mrf.mxu3 }
 0x1ba   : > { %v1919_v48 = vadd.f32 %v3472_v45, %v1918_v47 }
 0x1bc   : > { %3261 = vmatmul.msk.f32.vlgmr.msrb.gmra.mxu2 %vm1973_vm2, %v1919_v48 }
 0x1c1   : > { %v1921_v51 = vpop.f32.mrf.mxu0  ;;  %v2029_v60 = vpop.f32.mrf.mxu3 }
 0x1c2   : > { %v1922_v52 = vadd.f32 %v3472_v45, %v1921_v51 }
 0x1c4   : > { %3262 = vmatmul.msk.f32.gmra.mxu2 %vm1973_vm2, %v1922_v52 }
 0x22d   : > { %v2059_v54 = vpop.f32.mrf.mxu1 }
 0x235   : > { %v2062_v62 = vpop.f32.mrf.mxu1 }
 0x23f   : > { %v1997_v55 = vpop.f32.mrf.mxu2 }
 0x240   : > { %v2027_v56 = vadd.f32 %v2026_v53, %v1997_v55 }
 0x242   : > { %v2065_v58 = vadd.f32 %v2059_v54, %v2027_v56 }
 0x244   : > { %v2071_v59 = vadd.f32 %v3474_v57, %v2065_v58 }
 0x246   : > { %2073 = vst.msk [vmem:[#allocation2] sm:$0xff] %vm1973_vm2, %v2071_v59 }
 0x247   : > { %v2000_v61 = vpop.f32.mrf.mxu2 }
 0x248   : > { %v2030_v63 = vadd.f32 %v2029_v60, %v2000_v61 }
 0x24a   : > { %v2066_v0 = vadd.f32 %v2062_v62, %v2030_v63 }
 0x24c   : > { %v2072_v1 = vadd.f32 %v3474_v57, %v2066_v0 }
 0x24e   : > { %2074 = vst.msk [vmem:[#allocation2 + $0x8] sm:$0xff] %vm1973_vm2, %v2072_v1 }
 0x24f PF: > { %v2120_v2 = vld [vmem:[%s4282_s23 + $0x18] sm:$0xff]  ;;  %v2119_v4 = vld [vmem:[%s4282_s23 + $0x10] sm:$0xff]  ;;  %v2118_v6 = vld [vmem:[%s4282_s23 + $0x8] sm:$0xff]  ;;  %vm2085_vm3 = vcmask 261120   ;;  %s4697_s12 = scalar_lea.vmem %s4607_s13, %s4267_s26  ;;  %vm2179_vm4 = vcmask 130048   ;;  %s3942_s4 = smov 112  }
 0x250   : > { %v2080_v3 = vld [vmem:[%s4277_s25 + $0x18] sm:$0xff]  ;;  %2137 = vmatpush.msra.mxu1 %v2120_v2  ;;  %v2079_v5 = vld [vmem:[%s4277_s25 + $0x10] sm:$0xff]  ;;  %v2078_v7 = vld [vmem:[%s4277_s25 + $0x8] sm:$0xff]  ;;  %s4698_s17 = sld [smem:[#allocation86_spill]]  ;;  %vm2206_vm5 = vcmask 64512   ;;  %s3943_s5 = smov 16  }
 0x251   : > { %2104 = vmatpush.msra.mxu0 %v2080_v3  ;;  %v2117_v8 = vld [vmem:[%s4282_s23] sm:$0xff]  ;;  %v2151_v9 = vld [vmem:[%s4291_s20 + $0x18] sm:$0xff]  ;;  %v2150_v10 = vld [vmem:[%s4291_s20 + $0x10] sm:$0xff]  ;;  %vm2312_vm6 = vcmask 261248   ;;  %vm2601_vm14 = vcmask 523264   ;;  %p3291_p3 = scmp.ne.s32.totalorder %s3921_s0, 1 }
 0x252   : > { %2138 = vmatpush.msra.mxu1 %v2119_v4  ;;  %v2077_v11 = vld [vmem:[%s4277_s25] sm:$0xff]  ;;  %2168 = vmatpush.msra.mxu2 %v2151_v9  ;;  %v2149_v13 = vld [vmem:[%s4291_s20 + $0x8] sm:$0xff] }
 0x253   : > { %2105 = vmatpush.msra.mxu0 %v2079_v5  ;;  %v4427_v12 = vld [vmem:[#allocation2] sm:$0xff] }
 0x254   : > { %2139 = vmatpush.msra.mxu1 %v2118_v6  ;;  %2169 = vmatpush.msra.mxu2 %v2150_v10  ;;  %v2148_v14 = vld [vmem:[%s4291_s20] sm:$0xff]  ;;  %s4696_s20 = scalar_lea.vmem %s4609_s15, %s4267_s26 }
 0x255   : > { %2106 = vmatpush.msra.mxu0 %v2078_v7  ;;  %v4437_v15 = vld [vmem:[#allocation2 + $0x8] sm:$0xff]  ;;  %v3475_v16 = vld [vmem:[%s4696_s20] ss:$0 sm:$0xff]  ;;  %s4703_s20 = sld [smem:[#allocation90_spill]] }
 0x256   : > { %2140 = vmatpush.msra.mxu1 %v2117_v8  ;;  %2170 = vmatpush.msra.mxu2 %v2149_v13  ;;  %v3476_v17 = vld [vmem:[%s4697_s12] ss:$0 sm:$0xff]  ;;  %s4699_s21 = scalar_lea.vmem %s4698_s17, %s4267_s26 }
 0x257   : > { %2107 = vmatpush.msra.mxu0 %v2077_v11  ;;  %3269 = vmatmul.msk.f32.vlgmr.msra.gmra.mxu1 %vm2085_vm3, %v4427_v12  ;;  %v3477_v23 = vld [vmem:[%s4699_s21] ss:$0 sm:$0xff] }
 0x258   : > { %3267 = vmatmul.msk.f32.vlgmr.msra.gmra.mxu0 %vm2085_vm3, %v4427_v12  ;;  %2171 = vmatpush.msra.mxu2 %v2148_v14 }
 0x259   : > { %3271 = vmatmul.msk.f32.vlgmr.msra.gmra.mxu2 %vm2085_vm3, %v4427_v12 }
 0x25b   : > { %s4704_s14 = scalar_lea.vmem %s4703_s20, %s4267_s26 }
 0x25f   : > { %3270 = vmatmul.msk.f32.gmra.mxu1 %vm2085_vm3, %v4437_v15 }
 0x260   : > { %3268 = vmatmul.msk.f32.gmra.mxu0 %vm2085_vm3, %v4437_v15 }
 0x261   : > { %3272 = vmatmul.msk.f32.gmra.mxu2 %vm2085_vm3, %v4437_v15 }
 0x2d4   : > { %v2142_v18 = vpop.f32.mrf.mxu1 }
 0x2d5   : > { %v2109_v19 = vpop.f32.mrf.mxu0  ;;  %v2143_v20 = vadd.f32 %v3475_v16, %v2142_v18 }
 0x2d6   : > { %v2110_v21 = vadd.f32 %v3476_v17, %v2109_v19 }
 0x2d7   : > { %2244 = vrot.lane.b32.xlu1 %v2143_v20, %s3942_s4  ;;  %3273 = vmatpush.xpose.msk.msrb.mxu0 %vm2179_vm4, %v2143_v20 }
 0x2d8   : > { %v2115_v22 = vmul.f32 0.25, %v2110_v21  ;;  %v2451_v21 = vld [vmem:[%s4300_s11 + $0x18] sm:$0xff] }
 0x2da   : > { %3274 = vmatmul.msk.f32.vlgmr.msrb.gmra.mxu0 %vm2179_vm4, %v2115_v22 }
 0x2dc   : > { %v2145_v24 = vpop.f32.mrf.mxu1  ;;  %v2173_v28 = vpop.f32.mrf.mxu2 }
 0x2dd   : > { %v2112_v25 = vpop.f32.mrf.mxu0  ;;  %v2146_v26 = vadd.f32 %v3475_v16, %v2145_v24  ;;  %v4465_v30 = vadd.f32 %v3477_v23, %v2173_v28  ;;  %v2448_v24 = vld [vmem:[%s4300_s11] sm:$0xff] }
 0x2de   : > { %v2113_v27 = vadd.f32 %v3476_v17, %v2112_v25 }
 0x2df   : > { %2242 = vrot.lane.b32.xlu1 %v2115_v22, %s3942_s4  ;;  %3279 = vmatpush.xpose.msk.msrb.mxu1 %vm2179_vm4, %v2146_v26  ;;  %v2450_v22 = vld [vmem:[%s4300_s11 + $0x10] sm:$0xff] }
 0x2e0   : > { %v2116_v29 = vmul.f32 0.25, %v2113_v27  ;;  %2377 = vrot.lane.b32.xlu2 %v2146_v26, %s3942_s4  ;;  %2236 = vmatpush.msra.mxu3 %v4465_v30 }
 0x2e2   : > { %3280 = vmatmul.msk.f32.vlgmr.msrb.gmra.mxu1 %vm2179_vm4, %v2116_v29 }
 0x2e3   : > { %2474 = vmatpush.msra.mxu1 %v2451_v21 }
 0x2e4   : > { %v2176_v57 = vpop.f32.mrf.mxu2 }
 0x2e5   : > { %v2177_v58 = vadd.f32 %v3477_v23, %v2176_v57  ;;  %v2449_v23 = vld [vmem:[%s4300_s11 + $0x8] sm:$0xff]  ;;  %2475 = vmatpush.msra.mxu1 %v2450_v22 }
 0x2e7   : > { %2369 = vmatpush.msrb.mxu2 %v2177_v58  ;;  %2476 = vmatpush.msra.mxu1 %v2449_v23 }
 0x2e8   : > { %2375 = vrot.lane.b32.xlu2 %v2116_v29, %s3942_s4  ;;  %v3478_v29 = vld [vmem:[%s1198_s3] ss:$0 sm:$0xff] }
 0x2e9   : > { %2477 = vmatpush.msra.mxu1 %v2448_v24 }
 0x33a   : > { %v2378_v44 = vpop.permute.xlu2 %2377 }
 0x342   : > { %v2376_v46 = vpop.permute.xlu2 %2375 }
 0x349   : > { %v2245_v31 = vpop.permute.xlu1 %2244 }
 0x34a   : > { %3276 = vmatpush.xpose.msk.msrb.mxu3 %vm2179_vm4, %v2245_v31 }
 0x351   : > { %v2243_v45 = vpop.permute.xlu1 %2242 }
 0x357   : > { %v2203_v32 = vpop.f32.mrf.mxu0 }
 0x358   : > { %v2207_v33 = vsel %vm2206_vm5, %v2203_v32, -inf }
 0x359   : > { %2208 = vmax.xlane.f32.xlu0 %v2207_v33 }
 0x35f   : > { %v2337_v34 = vpop.f32.mrf.mxu1 }
 0x360   : > { %v2340_v35 = vsel %vm2206_vm5, %v2337_v34, -inf }
 0x361   : > { %2341 = vmax.xlane.f32.xlu2 %v2340_v35 }
 0x379   : > { %2415 = vrot.lane.b32.xlu2 %v2177_v58, %s3942_s4 }
 0x3cc   : > { %v2209_v36 = vpop.xlane.xlu0 %2208 }
 0x3cd   : > { %v2210_v37 = vsub.f32 %v2203_v32, %v2209_v36 }
 0x3cf   : > { %v2211_v38 = vmul.f32 1.442695, %v2210_v37 }
 0x3d1   : > { %3485 = vpow2.f32 %v2211_v38  ;;  %v3944_v38 = vmov 32.0  }
 0x3d4   : > { %v2342_v48 = vpop.xlane.xlu2 %2341 }
 0x3d5   : > { %v2343_v49 = vsub.f32 %v2337_v34, %v2342_v48 }
 0x3d7   : > { %v3486_v39 = vpop.eup %3485  ;;  %v2344_v52 = vmul.f32 1.442695, %v2343_v49 }
 0x3d8   : > { %v2213_v40 = vsel %vm2206_vm5, %v3486_v39, 0.0 }
 0x3d9   : > { %2214 = vadd.xlane.f32.xlu0 %v2213_v40 }
 0x3dc   : > { %v2416_v14 = vpop.permute.xlu2 %2415 }
 0x44c   : > { %v2215_v41 = vpop.xlane.xlu0 %2214 }
 0x44d   : > { %3487 = vrcp.f32 %v2215_v41 }
 0x44e   : > { %3489 = vpow2.f32 %v2344_v52 }
 0x453   : > { %v3488_v42 = vpop.eup %3487 }
 0x454   : > { %v2217_v43 = vmul.f32 %v3488_v42, %v3486_v39  ;;  %v3490_v55 = vpop.eup %3489 }
 0x455   : > { %v2346_v56 = vsel %vm2206_vm5, %v3490_v55, 0.0 }
 0x456   : > { %3275 = vmatmul.msk.f32.vlgmr.msra.gmra.mxu3 %vm2206_vm5, %v2217_v43 }
 0x457   : > { %3282 = vmatpush.xpose.msk.msra.mxu3 %vm2179_vm4, %v2378_v44 }
 0x45e   : > { %3277 = vmatmul.msk.f32.vlgmr.msrb.gmra.mxu3 %vm2179_vm4, %v2243_v45 }
 0x466   : > { %3283 = vmatmul.msk.f32.vlgmr.msra.gmra.mxu3 %vm2179_vm4, %v2376_v46 }
 0x4d9   : > { %v2238_v47 = vpop.f32.mrf.mxu3 }
 0x4da   : > { %2241 = vst.msk [vmem:[#allocation4] sm:$0xff] %vm2179_vm4, %v2238_v47 }
 0x4e1   : > { %v2267_v50 = vpop.f32.mrf.mxu3 }
 0x4e2   : > { %v2270_v51 = vsel %vm2206_vm5, %v2267_v50, -inf }
 0x4e3   : > { %2271 = vmax.xlane.f32.xlu0 %v2270_v51 }
 0x4e9   : > { %v2400_v53 = vpop.f32.mrf.mxu3 }
 0x4ea   : > { %v2403_v54 = vsel %vm2206_vm5, %v2400_v53, -inf }
 0x4eb   : > { %2404 = vmax.xlane.f32.xlu1 %v2403_v54  ;;  %v2552_v54 = vld [vmem:[%s4259_s1 + $0x10] sm:$0xff] }
 0x4f3   : > { %2347 = vadd.xlane.f32.xlu1 %v2346_v56  ;;  %v2550_v56 = vld [vmem:[%s4259_s1] sm:$0xff] }
 0x556   : > { %v2272_v59 = vpop.xlane.xlu0 %2271 }
 0x557   : > { %v2273_v60 = vsub.f32 %v2267_v50, %v2272_v59 }
 0x559   : > { %v2274_v61 = vmul.f32 1.442695, %v2273_v60  ;;  %v2596_v60 = vld [vmem:[%s4326_s30 + $0x38] sm:$0xff] }
 0x55a   : > { %2616 = vmatpush.msrb.mxu3 %v2596_v60 }
 0x55b   : > { %3491 = vpow2.f32 %v2274_v61  ;;  %v2595_v61 = vld [vmem:[%s4326_s30 + $0x30] sm:$0xff] }
 0x55c   : > { %2617 = vmatpush.msrb.mxu3 %v2595_v61 }
 0x55e   : > { %v2405_v62 = vpop.xlane.xlu1 %2404 }
 0x55f   : > { %v2406_v63 = vsub.f32 %v2400_v53, %v2405_v62  ;;  %v2553_v53 = vld [vmem:[%s4259_s1 + $0x18] sm:$0xff]  ;;  %v2594_v62 = vld [vmem:[%s4326_s30 + $0x28] sm:$0xff] }
 0x560   : > { %2576 = vmatpush.msra.mxu2 %v2553_v53  ;;  %2618 = vmatpush.msrb.mxu3 %v2594_v62 }
 0x561   : > { %v3492_v0 = vpop.eup %3491  ;;  %v2407_v1 = vmul.f32 1.442695, %v2406_v63 }
 0x562   : > { %v2276_v2 = vsel %vm2206_vm5, %v3492_v0, 0.0  ;;  %2577 = vmatpush.msra.mxu2 %v2552_v54 }
 0x563   : > { %3493 = vpow2.f32 %v2407_v1  ;;  %2277 = vadd.xlane.f32.xlu0 %v2276_v2  ;;  %v2593_v1 = vld [vmem:[%s4326_s30 + $0x20] sm:$0xff] }
 0x564   : > { %2619 = vmatpush.msrb.mxu3 %v2593_v1 }
 0x566   : > { %v2348_v3 = vpop.xlane.xlu1 %2347 }
 0x567   : > { %3495 = vrcp.f32 %v2348_v3 }
 0x569   : > { %v3494_v4 = vpop.eup %3493 }
 0x56a   : > { %v2409_v5 = vsel %vm2206_vm5, %v3494_v4, 0.0 }
 0x56b   : > { %2410 = vadd.xlane.f32.xlu0 %v2409_v5 }
 0x56d   : > { %v3496_v6 = vpop.eup %3495 }
 0x56e   : > { %v2350_v7 = vmul.f32 %v3496_v6, %v3490_v55  ;;  %v2551_v55 = vld [vmem:[%s4259_s1 + $0x8] sm:$0xff]  ;;  %s4701_s1 = sld [smem:[#allocation89_spill]] }
 0x56f   : > { %2578 = vmatpush.msra.mxu2 %v2551_v55 }
 0x570   : > { %3281 = vmatmul.msk.f32.vlgmr.msrb.gmra.mxu2 %vm2206_vm5, %v2350_v7 }
 0x571   : > { %2579 = vmatpush.msra.mxu2 %v2550_v56 }
 0x574   : > { %s4702_s9 = scalar_lea.vmem %s4701_s1, %s4267_s26 }
 0x57f   : > { %2282 = vrot.lane.b32.xlu0 %v4465_v30, %s3942_s4 }
 0x5d6   : > { %v2278_v8 = vpop.xlane.xlu0 %2277 }
 0x5d7   : > { %3497 = vrcp.f32 %v2278_v8 }
 0x5dd   : > { %v3498_v10 = vpop.eup %3497 }
 0x5de   : > { %v2411_v9 = vpop.xlane.xlu0 %2410  ;;  %v2280_v11 = vmul.f32 %v3498_v10, %v3492_v0 }
 0x5df   : > { %3499 = vrcp.f32 %v2411_v9 }
 0x5e0   : > { %3501 = vrcp.f32 %v3944_v38  ;;  %v3482_v38 = vld [vmem:[%s1215_s28] ss:$0 sm:$0xff] }
 0x5e5   : > { %v3500_v17 = vpop.eup %3499 }
 0x5e6   : > { %v2413_v18 = vmul.f32 %v3500_v17, %v3494_v4  ;;  %v3502_v39 = vpop.eup %3501  ;;  %v2592_v4 = vld [vmem:[%s4326_s30 + $0x18] sm:$0xff] }
 0x5e7   : > { %v2496_v40 = vmul.f32 32.0, %v3502_v39  ;;  %vm2500_vm7 = vweird.f32 %v3502_v39  ;;  %2620 = vmatpush.msrb.mxu3 %v2592_v4 }
 0x5e9   : > { %v2497_v41 = vsub.f32 1.0, %v2496_v40 }
 0x5eb   : > { %v2498_v42 = vmul.f32 %v3502_v39, %v2497_v41 }
 0x5ed   : > { %v2499_v43 = vadd.f32 %v3502_v39, %v2498_v42 }
 0x5f1   : > { %v2283_v13 = vpop.permute.xlu0 %2282 }
 0x5f2   : > { %2303 = vmatpush.msra.mxu0 %v2283_v13  ;;  %v3479_v13 = vld [vmem:[%s4702_s9] ss:$0 sm:$0xff] }
 0x5f3   : > { %3278 = vmatmul.msk.f32.vlgmr.msra.gmra.mxu0 %vm2206_vm5, %v2280_v11  ;;  %v2371_v16 = vpop.f32.mrf.mxu2 }
 0x5f4   : > { %2374 = vst.msk [vmem:[#allocation4 + $0x8] sm:$0xff] %vm2179_vm4, %v2371_v16  ;;  %2436 = vmatpush.msrb.mxu0 %v2416_v14 }
 0x5fb   : > { %3284 = vmatmul.msk.f32.vlgmr.msrb.gmra.mxu0 %vm2206_vm5, %v2413_v18  ;;  %v3480_v18 = vld [vmem:[%s4704_s14] ss:$0 sm:$0xff] }
 0x670   : > { %v2305_v19 = vpop.f32.mrf.mxu0 }
 0x671   : > { %2309 = vrot.lane.b32.xlu0 %v2305_v19, %s3943_s5 }
 0x678   : > { %v2438_v20 = vpop.f32.mrf.mxu0 }
 0x679   : > { %2442 = vrot.lane.b32.xlu1 %v2438_v20, %s3943_s5 }
 0x6e3   : > { %v2310_v25 = vpop.permute.xlu0 %2309 }
 0x6e4   : > { %2313 = vst.msk [vmem:[#allocation4] sm:$0xff] %vm2312_vm6, %v2310_v25 }
 0x6eb   : > { %v2443_v26 = vpop.permute.xlu1 %2442  ;;  %v2446_v27 = vld [vmem:[#allocation4] sm:$0xff] }
 0x6ec   : > { %2445 = vst.msk [vmem:[#allocation4 + $0x8] sm:$0xff] %vm2312_vm6, %v2443_v26  ;;  %3285 = vmatmul.msk.f32.vlgmr.msra.gmra.mxu1 %vm2085_vm3, %v2446_v27 }
 0x6f3   : > { %v2447_v28 = vld [vmem:[#allocation4 + $0x8] sm:$0xff] }
 0x6f4   : > { %3286 = vmatmul.msk.f32.gmra.mxu1 %vm2085_vm3, %v2447_v28  ;;  %v2591_v28 = vld [vmem:[%s4326_s30 + $0x10] sm:$0xff] }
 0x6f5   : > { %2621 = vmatpush.msrb.mxu3 %v2591_v28 }
 0x769   : > { %v2479_v30 = vpop.f32.mrf.mxu1 }
 0x76a   : > { %v2480_v31 = vadd.f32 %v3478_v29, %v2479_v30  ;;  %v2589_v30 = vld [vmem:[%s4326_s30] sm:$0xff] }
 0x76c   : > { %v2485_v32 = vadd.f32 %v2480_v31, %v4427_v12  ;;  %v4507_v12 = vsel %vm2500_vm7, %v3502_v39, %v2499_v43  ;;  %v3481_v31 = vld [vmem:[%s1207_s19] ss:$0 sm:$0xff] }
 0x76e   : > { %v2489_v33 = vsel %vm2085_vm3, %v2485_v32, 0.0 }
 0x76f   : > { %2490 = vadd.xlane.f32.xlu0 %v2489_v33 }
 0x771   : > { %v2482_v34 = vpop.f32.mrf.mxu1 }
 0x772   : > { %v2483_v35 = vadd.f32 %v3478_v29, %v2482_v34  ;;  %v2590_v29 = vld [vmem:[%s4326_s30 + $0x8] sm:$0xff] }
 0x773   : > { %2622 = vmatpush.msrb.mxu3 %v2590_v29 }
 0x774   : > { %v2486_v36 = vadd.f32 %v2483_v35, %v4437_v15 }
 0x775   : > { %2623 = vmatpush.msrb.mxu3 %v2589_v30 }
 0x776   : > { %v2492_v37 = vsel %vm2085_vm3, %v2486_v36, 0.0 }
 0x777   : > { %2493 = vadd.xlane.f32.xlu2 %v2492_v37 }
 0x7e2   : > { %v2491_v44 = vpop.xlane.xlu0 %2490 }
 0x7e3   : > { %v2502_v45 = vmul.f32 %v4507_v12, %v2491_v44 }
 0x7e5   : > { %v2504_v15 = vsub.f32 %v2485_v32, %v2502_v45 }
 0x7e7   : > { %v2506_v46 = vmul.f32 %v2504_v15, %v2504_v15 }
 0x7e9   : > { %v2508_v47 = vsel %vm2085_vm3, %v2506_v46, 0.0 }
 0x7ea   : > { %v2494_v48 = vpop.xlane.xlu2 %2493  ;;  %2509 = vadd.xlane.f32.xlu1 %v2508_v47 }
 0x7eb   : > { %v2503_v49 = vmul.f32 %v4507_v12, %v2494_v48 }
 0x7ed   : > { %v2505_v50 = vsub.f32 %v2486_v36, %v2503_v49 }
 0x7ef   : > { %v2507_v51 = vmul.f32 %v2505_v50, %v2505_v50 }
 0x7f1   : > { %v2511_v52 = vsel %vm2085_vm3, %v2507_v51, 0.0 }
 0x7f2   : > { %2512 = vadd.xlane.f32.xlu0 %v2511_v52 }
 0x85d   : > { %v2510_v57 = vpop.xlane.xlu1 %2509 }
 0x85e   : > { %v2514_v58 = vmul.f32 %v2510_v57, %v4507_v12 }
 0x860   : > { %v2516_v59 = vadd.f32 1e-05, %v2514_v58 }
 0x862   : > { %3503 = vrsqrt.f32 %v2516_v59  ;;  %vm2524_vm9 = vweird.f32 %v2516_v59 }
 0x865   : > { %v2513_v63 = vpop.xlane.xlu0 %2512 }
 0x866   : > { %v2515_v0 = vmul.f32 %v2513_v63, %v4507_v12 }
 0x868   : > { %v3504_v2 = vpop.eup %3503  ;;  %v2517_v3 = vadd.f32 1e-05, %v2515_v0 }
 0x869   : > { %v2519_v5 = vmul.f32 %v3504_v2, %v2516_v59  ;;  %vm2525_vm8 = vweird.f32 %v3504_v2 }
 0x86a   : > { %3505 = vrsqrt.f32 %v2517_v3  ;;  %vm2526_vm10 = vmor %vm2524_vm9, %vm2525_vm8  ;;  %vm2534_vm12 = vweird.f32 %v2517_v3 }
 0x86b   : > { %v2520_v6 = vmul.f32 %v3504_v2, %v2519_v5 }
 0x86d   : > { %v2521_v7 = vmul.f32 0.5, %v2520_v6  ;;  %v3483_v6 = vld [vmem:[%s1218_s10] ss:$0 sm:$0xff] }
 0x86f   : > { %v2522_v8 = vsub.f32 1.5, %v2521_v7 }
 0x870   : > { %v3506_v9 = vpop.eup %3505 }
 0x871   : > { %v2523_v10 = vmul.f32 %v3504_v2, %v2522_v8  ;;  %v2529_v11 = vmul.f32 %v3506_v9, %v2517_v3  ;;  %vm2535_vm11 = vweird.f32 %v3506_v9  ;;  %v3484_v8 = vld [vmem:[%s1221_s6] ss:$0 sm:$0xff] }
 0x872   : > { %vm2536_vm13 = vmor %vm2534_vm12, %vm2535_vm11 }
 0x873   : > { %v2527_v14 = vsel %vm2526_vm10, %v3504_v2, %v2523_v10  ;;  %v2530_v16 = vmul.f32 %v3506_v9, %v2529_v11 }
 0x874   : > { %v2538_v17 = vmul.f32 %v2527_v14, %v2504_v15 }
 0x875   : > { %v2531_v19 = vmul.f32 0.5, %v2530_v16 }
 0x876   : > { %v2543_v20 = vmul.f32 %v3479_v13, %v2538_v17 }
 0x877   : > { %v2532_v21 = vsub.f32 1.5, %v2531_v19 }
 0x878   : > { %v2548_v22 = vadd.f32 %v3480_v18, %v2543_v20 }
 0x879   : > { %v2533_v23 = vmul.f32 %v3506_v9, %v2532_v21 }
 0x87a   : > { %3287 = vmatmul.msk.f32.vlgmr.msra.gmra.mxu2 %vm2085_vm3, %v2548_v22 }
 0x87b   : > { %v2537_v24 = vsel %vm2536_vm13, %v3506_v9, %v2533_v23 }
 0x87c   : > { %v2539_v25 = vmul.f32 %v2537_v24, %v2505_v50 }
 0x87e   : > { %v2544_v26 = vmul.f32 %v3479_v13, %v2539_v25 }
 0x880   : > { %v2549_v27 = vadd.f32 %v3480_v18, %v2544_v26 }
 0x882   : > { %3288 = vmatmul.msk.f32.gmra.mxu2 %vm2085_vm3, %v2549_v27 }
 0x8fd   : > { %v2581_v32 = vpop.f32.mrf.mxu2 }
 0x8fe   : > { %v2582_v33 = vadd.f32 %v3481_v31, %v2581_v32 }
 0x900   : > { %v2587_v34 = vmax.f32 %v2582_v33, 0.0 }
 0x902   : > { %3289 = vmatmul.msk.f32.vlgmr.msrb.gmra.mxu3 %vm2601_vm14, %v2587_v34 }
 0x905   : > { %v2584_v35 = vpop.f32.mrf.mxu2 }
 0x906   : > { %v2585_v36 = vadd.f32 %v3481_v31, %v2584_v35 }
 0x908   : > { %v2588_v37 = vmax.f32 %v2585_v36, 0.0 }
 0x90a   : > { %3290 = vmatmul.msk.f32.gmra.mxu3 %vm2601_vm14, %v2588_v37 }
 0x985   : > { %v2625_v39 = vpop.f32.mrf.mxu3 }
 0x986   : > { %v2626_v40 = vadd.f32 %v3482_v38, %v2625_v39 }
 0x988   : > { %v2631_v41 = vadd.f32 %v2626_v40, %v2548_v22 }
 0x98a   : > { %v2635_v42 = vsel %vm2085_vm3, %v2631_v41, 0.0 }
 0x98b   : > { %2636 = vadd.xlane.f32.xlu0 %v2635_v42 }
 0x98d   : > { %v2628_v43 = vpop.f32.mrf.mxu3 }
 0x98e   : > { %v2629_v44 = vadd.f32 %v3482_v38, %v2628_v43 }
 0x990   : > { %v2632_v45 = vadd.f32 %v2629_v44, %v2549_v27 }
 0x992   : > { %v2638_v15 = vsel %vm2085_vm3, %v2632_v45, 0.0 }
 0x993   : > { %2639 = vadd.xlane.f32.xlu2 %v2638_v15 }
 0x9fe   : > { %v2637_v46 = vpop.xlane.xlu0 %2636 }
 0x9ff   : > { %v2641_v47 = vmul.f32 %v2637_v46, %v4507_v12 }
 0xa01   : > { %v2643_v48 = vsub.f32 %v2631_v41, %v2641_v47 }
 0xa03   : > { %v2645_v49 = vmul.f32 %v2643_v48, %v2643_v48 }
 0xa05   : > { %v2647_v50 = vsel %vm2085_vm3, %v2645_v49, 0.0 }
 0xa06   : > { %v2640_v51 = vpop.xlane.xlu2 %2639  ;;  %2648 = vadd.xlane.f32.xlu0 %v2647_v50 }
 0xa07   : > { %v2642_v52 = vmul.f32 %v2640_v51, %v4507_v12 }
 0xa09   : > { %v2644_v53 = vsub.f32 %v2632_v45, %v2642_v52 }
 0xa0b   : > { %v2646_v54 = vmul.f32 %v2644_v53, %v2644_v53 }
 0xa0d   : > { %v2650_v55 = vsel %vm2085_vm3, %v2646_v54, 0.0 }
 0xa0e   : > { %2651 = vadd.xlane.f32.xlu2 %v2650_v55 }
 0xa79   : > { %v2649_v56 = vpop.xlane.xlu0 %2648 }
 0xa7a   : > { %v2653_v57 = vmul.f32 %v2649_v56, %v4507_v12 }
 0xa7c   : > { %v2655_v58 = vadd.f32 1e-05, %v2653_v57 }
 0xa7e   : > { %3507 = vrsqrt.f32 %v2655_v58  ;;  %vm2663_vm0 = vweird.f32 %v2655_v58 }
 0xa81   : > { %v2652_v59 = vpop.xlane.xlu2 %2651 }
 0xa82   : > { %v2654_v60 = vmul.f32 %v2652_v59, %v4507_v12 }
 0xa84   : > { %v3508_v61 = vpop.eup %3507  ;;  %v2656_v62 = vadd.f32 1e-05, %v2654_v60 }
 0xa85   : > { %v2658_v63 = vmul.f32 %v3508_v61, %v2655_v58  ;;  %vm2664_vm15 = vweird.f32 %v3508_v61 }
 0xa86   : > { %3509 = vrsqrt.f32 %v2656_v62  ;;  %vm2665_vm1 = vmor %vm2663_vm0, %vm2664_vm15  ;;  %vm2673_vm4 = vweird.f32 %v2656_v62 }
 0xa87   : > { %v2659_v0 = vmul.f32 %v3508_v61, %v2658_v63 }
 0xa89   : > { %v2660_v1 = vmul.f32 0.5, %v2659_v0 }
 0xa8b   : > { %v2661_v2 = vsub.f32 1.5, %v2660_v1 }
 0xa8c   : > { %v3510_v3 = vpop.eup %3509 }
 0xa8d   : > { %v2662_v4 = vmul.f32 %v3508_v61, %v2661_v2  ;;  %v2668_v5 = vmul.f32 %v3510_v3, %v2656_v62  ;;  %vm2674_vm2 = vweird.f32 %v3510_v3 }
 0xa8e   : > { %vm2675_vm5 = vmor %vm2673_vm4, %vm2674_vm2 }
 0xa8f   : > { %v2666_v12 = vsel %vm2665_vm1, %v3508_v61, %v2662_v4  ;;  %v2669_v7 = vmul.f32 %v3510_v3, %v2668_v5 }
 0xa90   : > { %v2677_v9 = vmul.f32 %v2666_v12, %v2643_v48 }
 0xa91   : > { %v2670_v10 = vmul.f32 0.5, %v2669_v7 }
 0xa92   : > { %v2682_v11 = vmul.f32 %v3483_v6, %v2677_v9 }
 0xa93   : > { %v2671_v13 = vsub.f32 1.5, %v2670_v10 }
 0xa94   : > { %v2687_v14 = vadd.f32 %v3484_v8, %v2682_v11 }
 0xa95   : > { %v2672_v16 = vmul.f32 %v3510_v3, %v2671_v13 }
 0xa96   : > { %2689 = vst.msk [vmem:[#allocation2] sm:$0xff] %vm2085_vm3, %v2687_v14 }
 0xa97   : > { %v2676_v17 = vsel %vm2675_vm5, %v3510_v3, %v2672_v16 }
 0xa98   : > { %v2678_v18 = vmul.f32 %v2676_v17, %v2644_v53 }
 0xa9a   : > { %v2683_v19 = vmul.f32 %v3483_v6, %v2678_v18  ;;  %2694 = sbr.rel (%p3291_p3) target bundleno = 2721 (0xaa1), region = 648 }
 0xa9c   : > { %v2688_v20 = vadd.f32 %v3484_v8, %v2683_v19 }
 0xa9e   : > { %2690 = vst.msk [vmem:[#allocation2 + $0x8] sm:$0xff] %vm2085_vm3, %v2688_v20 }
 0xa9f   : > { %2695 = vst.msk [vmem:[#allocation23] sm:$0xff] %vm2085_vm3, %v2687_v14 }
 0xaa0   : > { %2696 = vst.msk [vmem:[#allocation23 + $0x8] sm:$0xff] %vm2085_vm3, %v2688_v20 }
 0xaa1 PF: > { %s4709_s6 = sld [smem:[#allocation68_spill]]  ;;  %s3945_s11 = smov [#allocation23]  }
 0xaa2   : > { %s4710_s24 = sld [smem:[#allocation97_spill]]  ;;  %s2705_s3 = sshll.u32 %s3945_s11, 4  ;;  %s2706_s3 = int_to_ptr.vmem [resolvable:$true] %s2705_s3 }
 0xaa3   : > { %s3946_s1 = smov 128   ;;  %s3947_s9 = smov 8  }
 0xaa7   : > { %p3405_p4 = scmp.eq.s32.totalorder %s4709_s6, 1 }
 0xaa8   : > { %s2707_s27 = sshll.u32 %s4710_s24, 4  ;;  %s2708_s27 = int_to_ptr.hbm [resolvable:$true] %s2707_s27 }
 0xaa9   : > { %3356 = dma.vmem_to_hbm [thread:$0]  (%p3405_p4), %s2706_s3, 256, %s2708_s27, [#allocation10], %s3946_s1, %s3946_s1, %s3947_s9  }
 0xaaa   : > { %3904 = dma.done.wait (%p3405_p4), [#allocation10], 256  }
 0xaab   : > { %3906 = vsyncadd (%p3405_p4), [#allocation10], 4294967040 }
 0xaac PF: > { %s4711_s0 = sld [smem:[#allocation67_spill]] }
 0xaad   : > { %s4712_s3 = sld [smem:[#allocation64_spill]] }
 0xaae   : > { %s4713_s6 = sld [smem:[#allocation65_spill]] }
 0xaaf   : > { %s4714_s10 = sld [smem:[#allocation70_spill]] }
 0xab0   : > { %s4716_s11 = sld [smem:[#allocation69_spill]] }
 0xab2   : > { %s52_s21 = sadd.s32 1, %s4711_s0   ;;  %s4715_s0 = sld [smem:[#allocation66_spill]] }
 0xab3   : > { %p49_p5 = scmp.ge.s32.totalorder %s52_s21, 4  }
 0xab5   :  { %51 = sbr.rel (!%p49_p5) target bundleno = 47 (0x2f), region = 855 }
 0xaba   :  { %2724 = vsyncpa [#allocation9], 1 }
 0xabb   :  { %2726 = vsyncpa [#allocation9 + $0x1], 1 }
 0xabc   :  { %2727 = vsyncpa [#allocation12], 1 }
 0xabd   :  { %2728 = vsyncpa [#allocation15], 1 }
 0xabe   :  { %2729 = vsyncpa [#allocation18], 1 }
 0xabf   :  { %2730 = vsyncpa [#allocation21], 1 }
 0xac0   :  { %2731 = vsyncpa [#allocation10], 1 }
 0xac1   :  { %2733 = vsyncpa [#allocation10 + $0x1], 1 }
 0xac2   :  { %2734 = vsyncmov [#allocation5] }
 0xac5   :  { %s2735_s25 = vpop.sfrf %2734 }
 0xac6   :  { %p3296_p6 = scmp.ne.s32.totalorder %s2735_s25, 0 }
 0xac8   :  { %2739 = shalt.err (%p3296_p6)  }
 0xac9   :  { %2741 = vsyncmov [#allocation5 + $0x1] }
 0xacc   :  { %s2742_s23 = vpop.sfrf %2741 }
 0xacd   :  { %p3297_p7 = scmp.ne.s32.totalorder %s2742_s23, 0 }
 0xacf   :  { %2746 = shalt.err (%p3297_p7)  }
 0xad0   :  { %2748 = vsyncmov [#allocation5 + $0x2] }
 0xad3   :  { %s2749_s20 = vpop.sfrf %2748 }
 0xad4   :  { %p3298_p8 = scmp.ne.s32.totalorder %s2749_s20, 0 }
 0xad6   :  { %2753 = shalt.err (%p3298_p8)  }
 0xad7   :  { %2755 = vsyncmov [#allocation5 + $0x3] }
 0xada   :  { %s2756_s13 = vpop.sfrf %2755 }
 0xadb   :  { %p3299_p9 = scmp.ne.s32.totalorder %s2756_s13, 0 }
 0xadd   :  { %2760 = shalt.err (%p3299_p9)  }
 0xade   :  { %2762 = vsyncmov [#allocation5 + $0x4] }
 0xae1   :  { %s2763_s15 = vpop.sfrf %2762 }
 0xae2   :  { %p3300_p10 = scmp.ne.s32.totalorder %s2763_s15, 0 }
 0xae4   :  { %2767 = shalt.err (%p3300_p10)  }
 0xae5   :  { %2769 = vsyncmov [#allocation5 + $0x5] }
 0xae8   :  { %s2770_s7 = vpop.sfrf %2769 }
 0xae9   :  { %p3301_p11 = scmp.ne.s32.totalorder %s2770_s7, 0 }
 0xaeb   :  { %2774 = shalt.err (%p3301_p11)  }
 0xaec   :  { %2776 = vsyncmov [#allocation5 + $0x6] }
 0xaef   :  { %s2777_s18 = vpop.sfrf %2776 }
 0xaf0   :  { %p3302_p12 = scmp.ne.s32.totalorder %s2777_s18, 0 }
 0xaf2   :  { %2781 = shalt.err (%p3302_p12)  }
 0xaf3   :  { %2783 = vsyncmov [#allocation5 + $0x7] }
 0xaf6   :  { %s2784_s29 = vpop.sfrf %2783 }
 0xaf7   :  { %p3303_p13 = scmp.ne.s32.totalorder %s2784_s29, 0 }
 0xaf9   :  { %2788 = shalt.err (%p3303_p13)  }
 0xafa   :  { %2790 = vsyncmov [#allocation5 + $0x8] }
 0xafd   :  { %s2791_s14 = vpop.sfrf %2790 }
 0xafe   :  { %p3304_p0 = scmp.ne.s32.totalorder %s2791_s14, 0 }
 0xb00   :  { %2795 = shalt.err (%p3304_p0)  }
 0xb01   :  { %2797 = vsyncmov [#allocation5 + $0x9] }
 0xb04   :  { %s2798_s2 = vpop.sfrf %2797 }
 0xb05   :  { %p3305_p2 = scmp.ne.s32.totalorder %s2798_s2, 0 }
 0xb07   :  { %2802 = shalt.err (%p3305_p2)  }
 0xb08   :  { %2804 = vsyncmov [#allocation5 + $0xa] }
 0xb0b   :  { %s2805_s12 = vpop.sfrf %2804 }
 0xb0c   :  { %p3306_p1 = scmp.ne.s32.totalorder %s2805_s12, 0 }
 0xb0e   :  { %2809 = shalt.err (%p3306_p1)  }
 0xb0f   :  { %2811 = vsyncmov [#allocation5 + $0xb] }
 0xb12   :  { %s2812_s4 = vpop.sfrf %2811 }
 0xb13   :  { %p3307_p3 = scmp.ne.s32.totalorder %s2812_s4, 0 }
 0xb15   :  { %2816 = shalt.err (%p3307_p3)  }
 0xb16   :  { %2818 = vsyncmov [#allocation5 + $0xc] }
 0xb19   :  { %s2819_s8 = vpop.sfrf %2818 }
 0xb1a   :  { %p3308_p4 = scmp.ne.s32.totalorder %s2819_s8, 0 }
 0xb1c   :  { %2823 = shalt.err (%p3308_p4)  }
 0xb1d   :  { %2825 = vsyncmov [#allocation5 + $0xd] }
 0xb20   :  { %s2826_s16 = vpop.sfrf %2825 }
 0xb21   :  { %p3309_p5 = scmp.ne.s32.totalorder %s2826_s16, 0 }
 0xb23   :  { %2830 = shalt.err (%p3309_p5)  }
 0xb24   :  { %2832 = vsyncmov [#allocation5 + $0xe] }
 0xb27   :  { %s2833_s17 = vpop.sfrf %2832 }
 0xb28   :  { %p3310_p6 = scmp.ne.s32.totalorder %s2833_s17, 0 }
 0xb2a   :  { %2837 = shalt.err (%p3310_p6)  }
 0xb2b   :  { %2839 = vsyncmov [#allocation5 + $0xf] }
 0xb2e   :  { %s2840_s19 = vpop.sfrf %2839 }
 0xb2f   :  { %p3311_p7 = scmp.ne.s32.totalorder %s2840_s19, 0 }
 0xb31   :  { %2844 = shalt.err (%p3311_p7)  }

</bundles_post_ra>
